<compile_context>
chip_gen: v6e
topology: v6e:2x2x1
jax: 0.10.0
libtpu: 0.0.40
codegen_flags: <defaults>
</compile_context>

<pallas_src>
import functools

import jax
import jax.numpy as jnp
from jax.experimental import pallas as pl
from jax.experimental.pallas import tpu as pltpu

_LANE = 128
_VMEM_LIMIT = 32 * 1024 * 1024   # explicit so v5e (16 MiB scoped default) matches v6e/v7x


def _round_up(n, m):
    return ((n + m - 1) // m) * m


# ---------------------------------------------------------------------------
# Kernel 1: tiled GEMM + bias (+ReLU), used for the conv-as-GEMM path.
#   out[tm, tn] = act( x[tm, K] @ w[K, tn] + b[1, tn] )
# Weights arrive pre-padded bf16; activations cast to bf16 in-kernel; f32 acc.
# ---------------------------------------------------------------------------
def _gemm_bias_kernel(x_ref, w_ref, b_ref, o_ref, *, relu: bool):
    x = x_ref[...].astype(jnp.bfloat16)
    acc = jnp.dot(x, w_ref[...], preferred_element_type=jnp.float32)
    acc = acc + b_ref[...]
    if relu:
        acc = jnp.maximum(acc, 0.0)
    o_ref[...] = acc


def pallas_gemm_bias(x, w_padded, b_padded, *, relu=False, tm=256, tn=512):
    """y = act(x @ w + b).

    x:        [M, K]  f32
    w_padded: [K, Np] bf16 (pre-padded at init, Np % 128 == 0)
    b_padded: [1, Np] f32  (pre-padded at init)
    returns   [M, Np] f32  (caller slices the real N columns if needed)
    """
    M, K = x.shape
    Kw, Np = w_padded.shape
    assert Kw == K and b_padded.shape == (1, Np) and Np % _LANE == 0

    tn = min(tn, Np)
    tm = min(tm, M)
    if M % tm != 0:          # toy fallback: keep x resident as one block
        tm = M
    grid = (M // tm, Np // tn)

    return pl.pallas_call(
        functools.partial(_gemm_bias_kernel, relu=relu),
        out_shape=jax.ShapeDtypeStruct((M, Np), jnp.float32),
        grid_spec=pltpu.PrefetchScalarGridSpec(
            num_scalar_prefetch=0,
            grid=grid,
            in_specs=[
                pl.BlockSpec((tm, K), lambda i, j: (i, 0)),   # x: tiled over M
                pl.BlockSpec((K, tn), lambda i, j: (0, j)),   # w: tiled over N
                pl.BlockSpec((1, tn), lambda i, j: (0, j)),   # bias
            ],
            out_specs=pl.BlockSpec((tm, tn), lambda i, j: (i, j)),
        ),
        compiler_params=pltpu.CompilerParams(
            dimension_semantics=("parallel", "parallel"),
            vmem_limit_bytes=_VMEM_LIMIT,
        ),
    )(x, w_padded, b_padded)


# ---------------------------------------------------------------------------
# Kernel 2: fused backbone-FC + classifier head (one pallas_call).
#   features = feat @ fc_w + fc_b        ([B, 1024], recomputed per N-tile:
#                                          trivially cheap and avoids any
#                                          cross-core accumulator hazard under
#                                          a parallel grid)
#   logits   = features @ cls_w + cls_b  (tiled tn over class_nums)
# ---------------------------------------------------------------------------
def _fused_head_kernel(feat_ref, fcw_ref, fcb_ref, clsw_ref, clsb_ref, o_ref):
    feat = feat_ref[...].astype(jnp.bfloat16)
    feats = jnp.dot(feat, fcw_ref[...], preferred_element_type=jnp.float32)
    feats = feats + fcb_ref[...]
    logits = jnp.dot(feats.astype(jnp.bfloat16), clsw_ref[...],
                     preferred_element_type=jnp.float32)
    o_ref[...] = logits + clsb_ref[...]


def pallas_fused_head(feat, fc_w, fc_b, cls_w, cls_b, *, tn=512):
    """feat: [B, midp] f32; fc_w: [midp, Fp] bf16; cls_w: [Fp, Np] bf16.
    Returns padded logits [B, Np] f32."""
    B, mid = feat.shape
    midw, Fp = fc_w.shape
    Fpc, Np = cls_w.shape
    assert midw == mid and Fpc == Fp and Np % _LANE == 0

    tn = min(tn, Np)
    grid = (Np // tn,)   # class_nums=1010 -> Np=1024 -> 2 parallel tiles (both v7x TCs busy)

    return pl.pallas_call(
        _fused_head_kernel,
        out_shape=jax.ShapeDtypeStruct((B, Np), jnp.float32),
        grid_spec=pltpu.PrefetchScalarGridSpec(
            num_scalar_prefetch=0,
            grid=grid,
            in_specs=[
                pl.BlockSpec((B, mid), lambda j: (0, 0)),     # pooled features (resident)
                pl.BlockSpec((mid, Fp), lambda j: (0, 0)),    # fc weight (resident)
                pl.BlockSpec((1, Fp), lambda j: (0, 0)),      # fc bias (resident)
                pl.BlockSpec((Fp, tn), lambda j: (0, j)),     # classifier weight (tiled N)
                pl.BlockSpec((1, tn), lambda j: (0, j)),      # classifier bias (tiled N)
            ],
            out_specs=pl.BlockSpec((B, tn), lambda j: (0, j)),
        ),
        compiler_params=pltpu.CompilerParams(
            dimension_semantics=("parallel",),
            vmem_limit_bytes=_VMEM_LIMIT,
        ),
    )(feat, fc_w, fc_b, cls_w, cls_b)


# ---------------------------------------------------------------------------
# Plain-JAX glue
# ---------------------------------------------------------------------------
def im2col_3x3(x_nchw):
    """3x3, stride 1, pad 1 patches.  x: [B,C,H,W] -> [B*H*W, C*9]."""
    B, C, H, W = x_nchw.shape
    xp = jnp.pad(x_nchw, ((0, 0), (0, 0), (1, 1), (1, 1)))
    shifts = [xp[:, :, i:i + H, j:j + W] for i in range(3) for j in range(3)]
    patches = jnp.stack(shifts, axis=2)                      # [B, C, 9, H, W]
    patches = jnp.transpose(patches, (0, 3, 4, 1, 2))        # [B, H, W, C, 9]
    return patches.reshape(B * H * W, C * 9)


def init_params(key, in_ch=3, mid_ch=8, feat_dim=1000, class_nums=1010):
    """All padding + bf16 casting of weights happens HERE, once (hoisted out
    of the per-forward path)."""
    k1, k2, k3, k4, k5, k6 = jax.random.split(key, 6)
    conv_w = 0.05 * jax.random.normal(k1, (mid_ch, in_ch, 3, 3), jnp.float32)
    conv_b = 0.01 * jax.random.normal(k2, (mid_ch,), jnp.float32)
    fc_w = 0.05 * jax.random.normal(k3, (mid_ch, feat_dim), jnp.float32)
    fc_b = 0.01 * jax.random.normal(k4, (feat_dim,), jnp.float32)
    cls_w = 0.05 * jax.random.normal(k5, (feat_dim, class_nums), jnp.float32)
    cls_b = 0.01 * jax.random.normal(k6, (class_nums,), jnp.float32)

    K_conv = in_ch * 9
    mid_p = _round_up(mid_ch, _LANE)       # conv output lanes / fc input rows
    feat_p = _round_up(feat_dim, _LANE)    # 1000 -> 1024
    cls_p = _round_up(class_nums, _LANE)   # 1010 -> 1024

    conv_w_mat = conv_w.reshape(mid_ch, K_conv).T            # [C*9, mid_ch]
    params = {
        "conv_w": jnp.zeros((K_conv, mid_p), jnp.bfloat16)
                  .at[:, :mid_ch].set(conv_w_mat.astype(jnp.bfloat16)),
        "conv_b": jnp.zeros((1, mid_p), jnp.float32).at[0, :mid_ch].set(conv_b),
        # fc weight padded in BOTH dims (extra rows are zero so the zero-padded
        # pooled-feature lanes contribute nothing) -> no slicing in the fwd path.
        "fc_w": jnp.zeros((mid_p, feat_p), jnp.bfloat16)
                .at[:mid_ch, :feat_dim].set(fc_w.astype(jnp.bfloat16)),
        "fc_b": jnp.zeros((1, feat_p), jnp.float32).at[0, :feat_dim].set(fc_b),
        "cls_w": jnp.zeros((feat_p, cls_p), jnp.bfloat16)
                 .at[:feat_dim, :class_nums].set(cls_w.astype(jnp.bfloat16)),
        "cls_b": jnp.zeros((1, cls_p), jnp.float32).at[0, :class_nums].set(cls_b),
    }
    return params


@functools.partial(jax.jit, static_argnames=("class_nums",))
def model_forward(params, x_nchw, *, class_nums):
    B, C, H, W = x_nchw.shape

    # --- feature extractor (conv -> relu [fused in kernel] -> global avg pool) ---
    patches = im2col_3x3(x_nchw)                                  # [B*H*W, C*9]
    conv_out = pallas_gemm_bias(patches, params["conv_w"], params["conv_b"],
                                relu=True, tm=256, tn=128)        # [B*H*W, 128]
    conv_out = conv_out.reshape(B, H * W, conv_out.shape[-1])
    feat = jnp.mean(conv_out, axis=1)                             # [B, 128] (lanes >= mid_ch are 0)

    # --- fused backbone FC (-> 1000 features) + classifier Linear(1000, class_nums) ---
    logits_p = pallas_fused_head(feat, params["fc_w"], params["fc_b"],
                                 params["cls_w"], params["cls_b"], tn=512)
    return logits_p[:, :class_nums]


if __name__ == "__main__":
    key = jax.random.PRNGKey(0)
    k_params, k_x = jax.random.split(key)

    B, C, H, W = 2, 3, 16, 16          # small NCHW image batch
    class_nums = 1010                  # default from the PyTorch module

    params = init_params(k_params, in_ch=C, mid_ch=8,
                         feat_dim=1000, class_nums=class_nums)
    x = jax.random.normal(k_x, (B, C, H, W), jnp.float32)

    logits = model_forward(params, x, class_nums=class_nums)
    jax.block_until_ready(logits)
    assert logits.shape == (B, class_nums), logits.shape
    assert logits.dtype == jnp.float32
    print("KERNEL_OK")
</pallas_src>

<mosaic_0001>
module attributes {stable_mosaic.version = 11 : i64} {
  func.func @_gemm_bias_kernel(%arg0: i32, %arg1: i32, %arg2: memref<256x27xf32, #tpu.memory_space<vmem>>, %arg3: memref<27x128xbf16, #tpu.memory_space<vmem>>, %arg4: memref<1x128xf32, #tpu.memory_space<vmem>>, %arg5: memref<256x128xf32, #tpu.memory_space<vmem>>) attributes {dimension_semantics = [#tpu.dimension_semantics<parallel>, #tpu.dimension_semantics<parallel>], iteration_bounds = array<i64: 2, 1>, scalar_prefetch = 0 : i64, scratch_operands = 0 : i64, tpu.core_type = #tpu.core_type<tc>, window_params = [{transform_indices = @transform_0, window_bounds = array<i64: 256, 27>}, {transform_indices = @transform_1, window_bounds = array<i64: 27, 128>}, {transform_indices = @transform_2, window_bounds = array<i64: 1, 128>}, {transform_indices = @transform_3, window_bounds = array<i64: 256, 128>}]} {
    %c0 = arith.constant 0 : index
    %c0_0 = arith.constant 0 : index
    %0 = vector.load %arg2[%c0, %c0_0] : memref<256x27xf32, #tpu.memory_space<vmem>>, vector<256x27xf32>
    %1 = arith.truncf %0 : vector<256x27xf32> to vector<256x27xbf16>
    %c0_1 = arith.constant 0 : index
    %c0_2 = arith.constant 0 : index
    %2 = vector.load %arg3[%c0_1, %c0_2] : memref<27x128xbf16, #tpu.memory_space<vmem>>, vector<27x128xbf16>
    %cst = arith.constant dense<0.000000e+00> : vector<256x128xf32>
    %3 = tpu.matmul %1, %2, %cst {dimension_numbers = #tpu.dot_dimension_numbers<[1], [0], [0], [1], [0, 0, 1, 1], [], []>} : vector<256x27xbf16>, vector<27x128xbf16>, vector<256x128xf32> -> vector<256x128xf32>
    %c0_3 = arith.constant 0 : index
    %c0_4 = arith.constant 0 : index
    %4 = vector.load %arg4[%c0_3, %c0_4] : memref<1x128xf32, #tpu.memory_space<vmem>>, vector<1x128xf32>
    %5 = vector.broadcast %4 : vector<1x128xf32> to vector<256x128xf32>
    %6 = arith.addf %3, %5 : vector<256x128xf32>
    %cst_5 = arith.constant 0.000000e+00 : f32
    %7 = vector.broadcast %cst_5 : f32 to vector<256x128xf32>
    %8 = arith.maximumf %6, %7 : vector<256x128xf32>
    %c0_6 = arith.constant 0 : index
    %c0_7 = arith.constant 0 : index
    %9 = vector.load %arg5[%c0_6, %c0_7] : memref<256x128xf32, #tpu.memory_space<vmem>>, vector<256x128xf32>
    tpu.vector_store %arg5[%c0_6, %c0_7], %8 {strides = array<i32>} : memref<256x128xf32, #tpu.memory_space<vmem>>, vector<256x128xf32>,
    return
  }
  func.func @transform_0(%arg0: i32, %arg1: i32) -> (i32, i32) {
    %c0_i32 = arith.constant 0 : i32
    %c0_i32_0 = arith.constant 0 : i32
    return %arg0, %c0_i32 : i32, i32
  }
  func.func @transform_1(%arg0: i32, %arg1: i32) -> (i32, i32) {
    %c0_i32 = arith.constant 0 : i32
    %c0_i32_0 = arith.constant 0 : i32
    return %c0_i32, %arg1 : i32, i32
  }
  func.func @transform_2(%arg0: i32, %arg1: i32) -> (i32, i32) {
    %c0_i32 = arith.constant 0 : i32
    %c0_i32_0 = arith.constant 0 : i32
    return %c0_i32, %arg1 : i32, i32
  }
  func.func @transform_3(%arg0: i32, %arg1: i32) -> (i32, i32) {
    %c0_i32 = arith.constant 0 : i32
    return %arg0, %arg1 : i32, i32
  }
}

module attributes {stable_mosaic.version = 11 : i64} {
  func.func @_fused_head_kernel(%arg0: i32, %arg1: memref<2x128xf32, #tpu.memory_space<vmem>>, %arg2: memref<128x1024xbf16, #tpu.memory_space<vmem>>, %arg3: memref<1x1024xf32, #tpu.memory_space<vmem>>, %arg4: memref<1024x512xbf16, #tpu.memory_space<vmem>>, %arg5: memref<1x512xf32, #tpu.memory_space<vmem>>, %arg6: memref<2x512xf32, #tpu.memory_space<vmem>>) attributes {dimension_semantics = [#tpu.dimension_semantics<parallel>], iteration_bounds = array<i64: 2>, scalar_prefetch = 0 : i64, scratch_operands = 0 : i64, tpu.core_type = #tpu.core_type<tc>, window_params = [{pipeline_mode = #tpu.pipeline_mode<synchronous>, transform_indices = @transform_0, window_bounds = array<i64: 2, 128>}, {pipeline_mode = #tpu.pipeline_mode<synchronous>, transform_indices = @transform_1, window_bounds = array<i64: 128, 1024>}, {pipeline_mode = #tpu.pipeline_mode<synchronous>, transform_indices = @transform_2, window_bounds = array<i64: 1, 1024>}, {transform_indices = @transform_3, window_bounds = array<i64: 1024, 512>}, {transform_indices = @transform_4, window_bounds = array<i64: 1, 512>}, {transform_indices = @transform_5, window_bounds = array<i64: 2, 512>}]} {
    %c0 = arith.constant 0 : index
    %c0_0 = arith.constant 0 : index
    %0 = vector.load %arg1[%c0, %c0_0] : memref<2x128xf32, #tpu.memory_space<vmem>>, vector<2x128xf32>
    %1 = arith.truncf %0 : vector<2x128xf32> to vector<2x128xbf16>
    %c0_1 = arith.constant 0 : index
    %c0_2 = arith.constant 0 : index
    %2 = vector.load %arg2[%c0_1, %c0_2] : memref<128x1024xbf16, #tpu.memory_space<vmem>>, vector<128x1024xbf16>
    %cst = arith.constant dense<0.000000e+00> : vector<2x1024xf32>
    %3 = tpu.matmul %1, %2, %cst {dimension_numbers = #tpu.dot_dimension_numbers<[1], [0], [0], [1], [0, 0, 1, 1], [], []>} : vector<2x128xbf16>, vector<128x1024xbf16>, vector<2x1024xf32> -> vector<2x1024xf32>
    %c0_3 = arith.constant 0 : index
    %c0_4 = arith.constant 0 : index
    %4 = vector.load %arg3[%c0_3, %c0_4] : memref<1x1024xf32, #tpu.memory_space<vmem>>, vector<1x1024xf32>
    %5 = vector.broadcast %4 : vector<1x1024xf32> to vector<2x1024xf32>
    %6 = arith.addf %3, %5 : vector<2x1024xf32>
    %7 = arith.truncf %6 : vector<2x1024xf32> to vector<2x1024xbf16>
    %c0_5 = arith.constant 0 : index
    %c0_6 = arith.constant 0 : index
    %8 = vector.load %arg4[%c0_5, %c0_6] : memref<1024x512xbf16, #tpu.memory_space<vmem>>, vector<1024x512xbf16>
    %cst_7 = arith.constant dense<0.000000e+00> : vector<2x512xf32>
    %9 = tpu.matmul %7, %8, %cst_7 {dimension_numbers = #tpu.dot_dimension_numbers<[1], [0], [0], [1], [0, 0, 1, 1], [], []>} : vector<2x1024xbf16>, vector<1024x512xbf16>, vector<2x512xf32> -> vector<2x512xf32>
    %c0_8 = arith.constant 0 : index
    %c0_9 = arith.constant 0 : index
    %10 = vector.load %arg5[%c0_8, %c0_9] : memref<1x512xf32, #tpu.memory_space<vmem>>, vector<1x512xf32>
    %11 = vector.broadcast %10 : vector<1x512xf32> to vector<2x512xf32>
    %12 = arith.addf %9, %11 : vector<2x512xf32>
    %c0_10 = arith.constant 0 : index
    %c0_11 = arith.constant 0 : index
    %13 = vector.load %arg6[%c0_10, %c0_11] : memref<2x512xf32, #tpu.memory_space<vmem>>, vector<2x512xf32>
    tpu.vector_store %arg6[%c0_10, %c0_11], %12 {strides = array<i32>} : memref<2x512xf32, #tpu.memory_space<vmem>>, vector<2x512xf32>,
    return
  }
  func.func @transform_0(%arg0: i32) -> (i32, i32) {
    %c0_i32 = arith.constant 0 : i32
    %c0_i32_0 = arith.constant 0 : i32
    %c0_i32_1 = arith.constant 0 : i32
    return %c0_i32, %c0_i32_0 : i32, i32
  }
  func.func @transform_1(%arg0: i32) -> (i32, i32) {
    %c0_i32 = arith.constant 0 : i32
    %c0_i32_0 = arith.constant 0 : i32
    %c0_i32_1 = arith.constant 0 : i32
    return %c0_i32, %c0_i32_0 : i32, i32
  }
  func.func @transform_2(%arg0: i32) -> (i32, i32) {
    %c0_i32 = arith.constant 0 : i32
    %c0_i32_0 = arith.constant 0 : i32
    %c0_i32_1 = arith.constant 0 : i32
    return %c0_i32, %c0_i32_0 : i32, i32
  }
  func.func @transform_3(%arg0: i32) -> (i32, i32) {
    %c0_i32 = arith.constant 0 : i32
    %c0_i32_0 = arith.constant 0 : i32
    return %c0_i32, %arg0 : i32, i32
  }
  func.func @transform_4(%arg0: i32) -> (i32, i32) {
    %c0_i32 = arith.constant 0 : i32
    %c0_i32_0 = arith.constant 0 : i32
    return %c0_i32, %arg0 : i32, i32
  }
  func.func @transform_5(%arg0: i32) -> (i32, i32) {
    %c0_i32 = arith.constant 0 : i32
    %c0_i32_0 = arith.constant 0 : i32
    return %c0_i32, %arg0 : i32, i32
  }
}

</mosaic_0001>

<bundles_post_ra>
// kernel: model_forward.2
= control target key start
LH: loop header
LB: loop body
LE: loop exit
PB: predicated region body
PF: predicated region fallthrough
CT: control target
= control target key end

     0   :  { %s841_s12 = smov 0   ;;  %s843_s13 = smov 0   ;;  %s1008_s0 = inlined_call_operand.vmem [shape: f32[512,27], index: 0, kind: input, shape index: {}]   ;;  %s1009_s1 = inlined_call_operand.vmem [shape: bf16[27,128], index: 1, kind: input, shape index: {}]   ;;  %s1010_s2 = inlined_call_operand.vmem [shape: f32[1,128], index: 2, kind: input, shape index: {}]   ;;  %s1011_s3 = inlined_call_operand.vmem [shape: f32[512,128], index: 3, kind: output, shape index: {}]  }
   0x1   :  { %s845_s14 = smov 0  }
   0x2 LB: > { %s25_s15 = sadd.s32 1, %s814_s13  ;;  %p685_p0 = scmp.ge.s32.totalorder %s818_s14, 1  ;;  %s818_s14 = sphi %s845_s14, %s13_s14   ;;  %s814_s13 = sphi %s843_s13, %s1013_s13   ;;  %s810_s12 = sphi %s841_s12, %s1012_s12  }
   0x3   : > { %p27_p1 = scmp.ge.s32.totalorder %s25_s15, 2  ;;  %p169_p2 = scmp.lt.s32.totalorder %s818_s14, 3 }
   0x5   : > { %s1015_s15 = smov (%p27_p1, %s25_s15), 0  ;;  %p170_p3 = pnand %p685_p0, %p169_p2 }
   0x6   : > { %s686_s18 = sshll.u32 (!%p170_p3), %s810_s12, 5 }
   0x7   : > { %173 = sbr.rel (%p170_p3) target bundleno = 253 (0xfd), region = 32  ;;  %p204_p4 = scmp.lt.s32.totalorder (!%p170_p3), %s686_s18, 63 }
   0xc   : > { %v794_v0 = vld [vmem:[%s1009_s1 + $0x8] sm:$0x3f]   ;;  %vm345_vm0 = vcmask 1044480   ;;  %vm346_vm1 = vcmask 1045504   ;;  %v820_v1 = vmov 65535   ;;  %v795_v5 = vld [vmem:[%s1009_s1] sm:$0xff]  }
   0xd   : > { %v347_v2 = vsel %vm345_vm0, 4294967295, %v820_v1  ;;  %s1017_s18 = smov (!%p204_p4, %s686_s18), 63  ;;  %vm296_vm2 = vcmask 220160   ;;  %v926_v54 = vld [vmem:[%s1010_s2] ss:$0 sm:$0xff] }
   0xe   : > { %v348_v3 = vsel %vm346_vm1, %v347_v2, 0  ;;  %s687_s21 = sshll.u32 %s1017_s18, 3 }
   0xf   : > { %v350_v4 = vand.u32 %v794_v0, %v348_v3  ;;  %s873_s24 = scalar_lea.vmem %s1008_s0, %s687_s21  ;;  %s935_s29 = scalar_lea.vmem %s1011_s3, %s687_s21 }
  0x10   : > { %v226_v6 = vld [vmem:[%s873_s24] sm:$0xff]  ;;  %v227_v7 = vld [vmem:[%s873_s24 + $0x8] sm:$0xff]  ;;  %v228_v11 = vld [vmem:[%s873_s24 + $0x10] sm:$0xff] }
  0x11   : > { %729 = vmatprep.subr.bf16.mxu0 %v350_v4  ;;  %765 = vmatprep.subr.bf16.mxu1 %v350_v4  ;;  %v242_v8 = vld [vmem:[%s873_s24 + $0x80] sm:$0xff]  ;;  %v258_v9 = vpack.c.bf16 %v227_v7, %v226_v6  ;;  %v243_v10 = vld [vmem:[%s873_s24 + $0x88] sm:$0xff]  ;;  %v229_v12 = vld [vmem:[%s873_s24 + $0x18] sm:$0xff] }
  0x12   : > { %730 = vmatpush3.bf16.msra.mxu0 %v350_v4  ;;  %767 = vmatpush3.bf16.msra.mxu1 %v350_v4  ;;  %v266_v13 = vpack.c.bf16 %v243_v10, %v242_v8  ;;  %v259_v14 = vpack.c.bf16 %v229_v12, %v228_v11  ;;  %v244_v15 = vld [vmem:[%s873_s24 + $0x90] sm:$0xff]  ;;  %v245_v16 = vld [vmem:[%s873_s24 + $0x98] sm:$0xff]  ;;  %v230_v17 = vld [vmem:[%s873_s24 + $0x20] sm:$0xff] }
  0x13   : > { %731 = vmatprep.subr.bf16.mxu0 %v795_v5  ;;  %766 = vmatprep.subr.bf16.mxu1 %v795_v5  ;;  %v267_v18 = vpack.c.bf16 %v245_v16, %v244_v15  ;;  %v231_v19 = vld [vmem:[%s873_s24 + $0x28] sm:$0xff]  ;;  %v246_v20 = vld [vmem:[%s873_s24 + $0xa0] sm:$0xff]  ;;  %v232_v24 = vld [vmem:[%s873_s24 + $0x30] sm:$0xff] }
  0x14   : > { %733 = vmatprep.mubr.msk.bf16.mxu0 %vm296_vm2, %v258_v9  ;;  %v247_v21 = vld [vmem:[%s873_s24 + $0xa8] sm:$0xff]  ;;  %749 = vmatprep.mubr.msk.bf16.mxu1 %vm296_vm2, %v266_v13  ;;  %v260_v22 = vpack.c.bf16 %v231_v19, %v230_v17  ;;  %v233_v25 = vld [vmem:[%s873_s24 + $0x38] sm:$0xff]  ;;  %v248_v26 = vld [vmem:[%s873_s24 + $0xb0] sm:$0xff] }
  0x15   : > { %v268_v23 = vpack.c.bf16 %v247_v21, %v246_v20  ;;  %v249_v27 = vld [vmem:[%s873_s24 + $0xb8] sm:$0xff]  ;;  %v234_v28 = vld [vmem:[%s873_s24 + $0x40] sm:$0xff]  ;;  %v235_v29 = vld [vmem:[%s873_s24 + $0x48] sm:$0xff]  ;;  %v261_v32 = vpack.c.bf16 %v233_v25, %v232_v24 }
  0x16   : > { %732 = vmatpush3.bf16.msra.mxu0 %v795_v5  ;;  %768 = vmatpush3.bf16.msra.mxu1 %v795_v5  ;;  %v250_v30 = vld [vmem:[%s873_s24 + $0xc0] sm:$0xff]  ;;  %v251_v31 = vld [vmem:[%s873_s24 + $0xc8] sm:$0xff]  ;;  %v269_v33 = vpack.c.bf16 %v249_v27, %v248_v26  ;;  %v262_v34 = vpack.c.bf16 %v235_v29, %v234_v28  ;;  %v236_v36 = vld [vmem:[%s873_s24 + $0x50] sm:$0xff] }
  0x17   : > { %v270_v35 = vpack.c.bf16 %v251_v31, %v250_v30  ;;  %v237_v37 = vld [vmem:[%s873_s24 + $0x58] sm:$0xff]  ;;  %v252_v38 = vld [vmem:[%s873_s24 + $0xd0] sm:$0xff]  ;;  %v238_v40 = vld [vmem:[%s873_s24 + $0x60] sm:$0xff] }
  0x18   : > { %v253_v39 = vld [vmem:[%s873_s24 + $0xd8] sm:$0xff]  ;;  %v239_v41 = vld [vmem:[%s873_s24 + $0x68] sm:$0xff]  ;;  %v254_v42 = vld [vmem:[%s873_s24 + $0xe0] sm:$0xff]  ;;  %v263_v44 = vpack.c.bf16 %v237_v37, %v236_v36 }
  0x19   : > { %734 = vmatmul.mubr.msk.bf16.vlgmr.msra.gmra.mxu0 %vm296_vm2, %v259_v14  ;;  %750 = vmatmul.mubr.msk.bf16.vlgmr.msra.gmra.mxu1 %vm296_vm2, %v267_v18  ;;  %v255_v43 = vld [vmem:[%s873_s24 + $0xe8] sm:$0xff]  ;;  %v271_v45 = vpack.c.bf16 %v253_v39, %v252_v38  ;;  %v264_v46 = vpack.c.bf16 %v239_v41, %v238_v40  ;;  %v240_v48 = vld [vmem:[%s873_s24 + $0x70] sm:$0xff]  ;;  %v241_v49 = vld [vmem:[%s873_s24 + $0x78] sm:$0xff] }
  0x1a   : > { %737 = vmatprep.mubr.msk.bf16.mxu0 %vm296_vm2, %v260_v22  ;;  %753 = vmatprep.mubr.msk.bf16.mxu1 %vm296_vm2, %v268_v23  ;;  %v272_v47 = vpack.c.bf16 %v255_v43, %v254_v42  ;;  %v256_v50 = vld [vmem:[%s873_s24 + $0xf0] sm:$0xff]  ;;  %v257_v51 = vld [vmem:[%s873_s24 + $0xf8] sm:$0xff]  ;;  %v265_v52 = vpack.c.bf16 %v241_v49, %v240_v48 }
  0x1b   : > { %v273_v53 = vpack.c.bf16 %v257_v51, %v256_v50 }
  0x21   : > { %738 = vmatmul.mubr.msk.bf16.gmra.mxu0 %vm296_vm2, %v261_v32  ;;  %754 = vmatmul.mubr.msk.bf16.gmra.mxu1 %vm296_vm2, %v269_v33 }
  0x22   : > { %741 = vmatprep.mubr.msk.bf16.mxu0 %vm296_vm2, %v262_v34  ;;  %757 = vmatprep.mubr.msk.bf16.mxu1 %vm296_vm2, %v270_v35 }
  0x29   : > { %742 = vmatmul.mubr.msk.bf16.gmra.mxu0 %vm296_vm2, %v263_v44  ;;  %758 = vmatmul.mubr.msk.bf16.gmra.mxu1 %vm296_vm2, %v271_v45 }
  0x2a   : > { %745 = vmatprep.mubr.msk.bf16.mxu0 %vm296_vm2, %v264_v46  ;;  %761 = vmatprep.mubr.msk.bf16.mxu1 %vm296_vm2, %v272_v47 }
  0x31   : > { %746 = vmatmul.mubr.msk.bf16.gmra.mxu0 %vm296_vm2, %v265_v52  ;;  %762 = vmatmul.mubr.msk.bf16.gmra.mxu1 %vm296_vm2, %v273_v53 }
  0xd9   : > { %v735_v55 = vpop.f32.mrf.mxu0  ;;  %v751_v56 = vpop.f32.mrf.mxu1 }
  0xda   : > { %v395_v57 = vadd.f32 %v735_v55, %v926_v54  ;;  %v459_v58 = vadd.f32 %v751_v56, %v926_v54 }
  0xdb   : > { %v386_v59 = vpop.f32.mrf.mxu0  ;;  %v450_v60 = vpop.f32.mrf.mxu1 }
  0xdc   : > { %v515_v61 = vmax.f32 %v395_v57, 0.0  ;;  %v531_v62 = vmax.f32 %v459_v58, 0.0  ;;  %v387_v63 = vadd.f32 %v926_v54, %v386_v59  ;;  %v451_v0 = vadd.f32 %v926_v54, %v450_v60 }
  0xdd   : > { %v736_v1 = vpop.f32.mrf.mxu0  ;;  %v752_v2 = vpop.f32.mrf.mxu1 }
  0xde   : > { %547 = vst [vmem:[%s935_s29 + $0x10] sm:$0xff] %v515_v61  ;;  %563 = vst [vmem:[%s935_s29 + $0x90] sm:$0xff] %v531_v62  ;;  %v513_v3 = vmax.f32 %v387_v63, 0.0  ;;  %v529_v4 = vmax.f32 %v451_v0, 0.0  ;;  %v398_v5 = vadd.f32 %v736_v1, %v926_v54  ;;  %v462_v6 = vadd.f32 %v752_v2, %v926_v54 }
  0xdf   : > { %v389_v7 = vpop.f32.mrf.mxu0  ;;  %v453_v8 = vpop.f32.mrf.mxu1 }
  0xe0   : > { %545 = vst [vmem:[%s935_s29] sm:$0xff] %v513_v3  ;;  %561 = vst [vmem:[%s935_s29 + $0x80] sm:$0xff] %v529_v4  ;;  %v516_v9 = vmax.f32 %v398_v5, 0.0  ;;  %v532_v10 = vmax.f32 %v462_v6, 0.0  ;;  %v390_v11 = vadd.f32 %v926_v54, %v389_v7  ;;  %v454_v12 = vadd.f32 %v926_v54, %v453_v8 }
  0xe1   : > { %v739_v13 = vpop.f32.mrf.mxu0  ;;  %v755_v14 = vpop.f32.mrf.mxu1 }
  0xe2   : > { %548 = vst [vmem:[%s935_s29 + $0x18] sm:$0xff] %v516_v9  ;;  %564 = vst [vmem:[%s935_s29 + $0x98] sm:$0xff] %v532_v10  ;;  %v514_v15 = vmax.f32 %v390_v11, 0.0  ;;  %v530_v16 = vmax.f32 %v454_v12, 0.0  ;;  %v411_v17 = vadd.f32 %v739_v13, %v926_v54  ;;  %v475_v18 = vadd.f32 %v755_v14, %v926_v54 }
  0xe3   : > { %v402_v19 = vpop.f32.mrf.mxu0  ;;  %v466_v20 = vpop.f32.mrf.mxu1 }
  0xe4   : > { %546 = vst [vmem:[%s935_s29 + $0x8] sm:$0xff] %v514_v15  ;;  %562 = vst [vmem:[%s935_s29 + $0x88] sm:$0xff] %v530_v16  ;;  %v519_v21 = vmax.f32 %v411_v17, 0.0  ;;  %v535_v22 = vmax.f32 %v475_v18, 0.0  ;;  %v403_v23 = vadd.f32 %v926_v54, %v402_v19  ;;  %v467_v24 = vadd.f32 %v926_v54, %v466_v20 }
  0xe5   : > { %v740_v25 = vpop.f32.mrf.mxu0  ;;  %v756_v26 = vpop.f32.mrf.mxu1 }
  0xe6   : > { %551 = vst [vmem:[%s935_s29 + $0x30] sm:$0xff] %v519_v21  ;;  %567 = vst [vmem:[%s935_s29 + $0xb0] sm:$0xff] %v535_v22  ;;  %v517_v27 = vmax.f32 %v403_v23, 0.0  ;;  %v533_v28 = vmax.f32 %v467_v24, 0.0  ;;  %v414_v29 = vadd.f32 %v740_v25, %v926_v54  ;;  %v478_v30 = vadd.f32 %v756_v26, %v926_v54 }
  0xe7   : > { %v405_v31 = vpop.f32.mrf.mxu0  ;;  %v469_v32 = vpop.f32.mrf.mxu1 }
  0xe8   : > { %549 = vst [vmem:[%s935_s29 + $0x20] sm:$0xff] %v517_v27  ;;  %565 = vst [vmem:[%s935_s29 + $0xa0] sm:$0xff] %v533_v28  ;;  %v520_v33 = vmax.f32 %v414_v29, 0.0  ;;  %v536_v34 = vmax.f32 %v478_v30, 0.0  ;;  %v406_v35 = vadd.f32 %v926_v54, %v405_v31  ;;  %v470_v36 = vadd.f32 %v926_v54, %v469_v32 }
  0xe9   : > { %v743_v37 = vpop.f32.mrf.mxu0  ;;  %v759_v38 = vpop.f32.mrf.mxu1 }
  0xea   : > { %552 = vst [vmem:[%s935_s29 + $0x38] sm:$0xff] %v520_v33  ;;  %568 = vst [vmem:[%s935_s29 + $0xb8] sm:$0xff] %v536_v34  ;;  %v518_v39 = vmax.f32 %v406_v35, 0.0  ;;  %v534_v40 = vmax.f32 %v470_v36, 0.0  ;;  %v427_v41 = vadd.f32 %v743_v37, %v926_v54  ;;  %v491_v42 = vadd.f32 %v759_v38, %v926_v54 }
  0xeb   : > { %v418_v43 = vpop.f32.mrf.mxu0  ;;  %v482_v44 = vpop.f32.mrf.mxu1 }
  0xec   : > { %550 = vst [vmem:[%s935_s29 + $0x28] sm:$0xff] %v518_v39  ;;  %566 = vst [vmem:[%s935_s29 + $0xa8] sm:$0xff] %v534_v40  ;;  %v523_v45 = vmax.f32 %v427_v41, 0.0  ;;  %v539_v46 = vmax.f32 %v491_v42, 0.0  ;;  %v419_v47 = vadd.f32 %v926_v54, %v418_v43  ;;  %v483_v48 = vadd.f32 %v926_v54, %v482_v44 }
  0xed   : > { %v744_v49 = vpop.f32.mrf.mxu0  ;;  %v760_v50 = vpop.f32.mrf.mxu1 }
  0xee   : > { %555 = vst [vmem:[%s935_s29 + $0x50] sm:$0xff] %v523_v45  ;;  %571 = vst [vmem:[%s935_s29 + $0xd0] sm:$0xff] %v539_v46  ;;  %v521_v51 = vmax.f32 %v419_v47, 0.0  ;;  %v537_v52 = vmax.f32 %v483_v48, 0.0  ;;  %v430_v53 = vadd.f32 %v744_v49, %v926_v54  ;;  %v494_v55 = vadd.f32 %v760_v50, %v926_v54 }
  0xef   : > { %v421_v56 = vpop.f32.mrf.mxu0  ;;  %v485_v57 = vpop.f32.mrf.mxu1 }
  0xf0   : > { %553 = vst [vmem:[%s935_s29 + $0x40] sm:$0xff] %v521_v51  ;;  %569 = vst [vmem:[%s935_s29 + $0xc0] sm:$0xff] %v537_v52  ;;  %v524_v58 = vmax.f32 %v430_v53, 0.0  ;;  %v540_v59 = vmax.f32 %v494_v55, 0.0  ;;  %v422_v60 = vadd.f32 %v926_v54, %v421_v56  ;;  %v486_v61 = vadd.f32 %v926_v54, %v485_v57 }
  0xf1   : > { %v747_v62 = vpop.f32.mrf.mxu0  ;;  %v763_v63 = vpop.f32.mrf.mxu1 }
  0xf2   : > { %556 = vst [vmem:[%s935_s29 + $0x58] sm:$0xff] %v524_v58  ;;  %572 = vst [vmem:[%s935_s29 + $0xd8] sm:$0xff] %v540_v59  ;;  %v522_v0 = vmax.f32 %v422_v60, 0.0  ;;  %v538_v1 = vmax.f32 %v486_v61, 0.0  ;;  %v443_v2 = vadd.f32 %v747_v62, %v926_v54  ;;  %v507_v3 = vadd.f32 %v763_v63, %v926_v54 }
  0xf3   : > { %v434_v4 = vpop.f32.mrf.mxu0  ;;  %v498_v5 = vpop.f32.mrf.mxu1 }
  0xf4   : > { %554 = vst [vmem:[%s935_s29 + $0x48] sm:$0xff] %v522_v0  ;;  %570 = vst [vmem:[%s935_s29 + $0xc8] sm:$0xff] %v538_v1  ;;  %v527_v6 = vmax.f32 %v443_v2, 0.0  ;;  %v543_v7 = vmax.f32 %v507_v3, 0.0  ;;  %v435_v8 = vadd.f32 %v926_v54, %v434_v4  ;;  %v499_v9 = vadd.f32 %v926_v54, %v498_v5 }
  0xf5   : > { %v748_v10 = vpop.f32.mrf.mxu0  ;;  %v764_v11 = vpop.f32.mrf.mxu1 }
  0xf6   : > { %559 = vst [vmem:[%s935_s29 + $0x70] sm:$0xff] %v527_v6  ;;  %575 = vst [vmem:[%s935_s29 + $0xf0] sm:$0xff] %v543_v7  ;;  %v525_v12 = vmax.f32 %v435_v8, 0.0  ;;  %v541_v13 = vmax.f32 %v499_v9, 0.0  ;;  %v446_v14 = vadd.f32 %v748_v10, %v926_v54  ;;  %v510_v15 = vadd.f32 %v764_v11, %v926_v54 }
  0xf7   : > { %v437_v16 = vpop.f32.mrf.mxu0  ;;  %v501_v17 = vpop.f32.mrf.mxu1 }
  0xf8   : > { %557 = vst [vmem:[%s935_s29 + $0x60] sm:$0xff] %v525_v12  ;;  %573 = vst [vmem:[%s935_s29 + $0xe0] sm:$0xff] %v541_v13  ;;  %v528_v18 = vmax.f32 %v446_v14, 0.0  ;;  %v544_v19 = vmax.f32 %v510_v15, 0.0  ;;  %v438_v20 = vadd.f32 %v926_v54, %v437_v16  ;;  %v502_v21 = vadd.f32 %v926_v54, %v501_v17 }
  0xfa   : > { %560 = vst [vmem:[%s935_s29 + $0x78] sm:$0xff] %v528_v18  ;;  %576 = vst [vmem:[%s935_s29 + $0xf8] sm:$0xff] %v544_v19  ;;  %v526_v22 = vmax.f32 %v438_v20, 0.0  ;;  %v542_v23 = vmax.f32 %v502_v21, 0.0 }
  0xfc   : > { %558 = vst [vmem:[%s935_s29 + $0x68] sm:$0xff] %v526_v22  ;;  %574 = vst [vmem:[%s935_s29 + $0xe8] sm:$0xff] %v542_v23 }
  0xfd PF: > { %s13_s14 = sadd.s32 1, %s818_s14   ;;  %s1012_s12 = smov %s814_s13 }
  0xfe   : > { %p10_p5 = scmp.ge.s32.totalorder %s13_s14, 4   ;;  %s1013_s13 = smov %s1015_s15 }
 0x100   :  { %12 = sbr.rel (!%p10_p5) target bundleno = 2 (0x2), region = 68 }

// kernel: model_forward.3
= control target key start
LH: loop header
LB: loop body
LE: loop exit
PB: predicated region body
PF: predicated region fallthrough
CT: control target
= control target key end

     0   :  { %10 = vsyncpa [#allocation4], 0  ;;  %s5388_s0 = inlined_call_operand.vmem [shape: f32[2,128], index: 0, kind: input, shape index: {}]   ;;  %s5389_s1 = inlined_call_operand.vmem [shape: bf16[128,1024], index: 1, kind: input, shape index: {}]   ;;  %s5390_s2 = inlined_call_operand.vmem [shape: f32[1,1024], index: 2, kind: input, shape index: {}]   ;;  %s5391_s3 = inlined_call_operand.vmem [shape: bf16[1024,1024], index: 3, kind: input, shape index: {}]   ;;  %s5392_s4 = inlined_call_operand.vmem [shape: f32[1,1024], index: 4, kind: input, shape index: {}]   ;;  %s5393_s5 = inlined_call_operand.hbm [shape: f32[2,1024], index: 5, kind: output, shape index: {}]  }
   0x1   :  { %12 = vsyncpa [#allocation4 + $0x1], 0  ;;  %s4230_s18 = smov 0   ;;  %s4232_s19 = smov 0  }
   0x2   :  { %s4234_s20 = smov 0   ;;  %s4236_s21 = smov 0  }
   0x3 LB: > { %s4251_s22 = sadd.s32 4294967295, %s4195_s21   ;;  %s3373_s23 = sadd.s32 4294967294, %s4195_s21   ;;  %s4195_s21 = sphi %s4236_s21, %s5401_s21   ;;  %s4191_s20 = sphi %s4234_s20, %s5400_s20   ;;  %s4187_s19 = sphi %s4232_s19, %s5399_s19   ;;  %s4183_s18 = sphi %s4230_s18, %s5398_s18  }
   0x4   : > { %s4255_s24 = sadd.s32 1, %s4195_s21   ;;  %s88_s25 = sadd.s32 1, %s4191_s20 }
   0x5   : > { %s85_s26 = ssub.s32 %s4195_s21, %s4255_s24  ;;  %p95_p0 = scmp.ne.s32.totalorder %s4191_s20, %s4187_s19 }
   0x6   : > { %p86_p1 = scmp.eq.s32.totalorder %s85_s26, 0  ;;  %p96_p2 = scmp.eq.s32.totalorder %s4195_s21, 0 }
   0x7   : > { %p151_p3 = scmp.eq.s32.totalorder %s4251_s22, 1  ;;  %p156_p4 = scmp.ne.s32.totalorder %s4187_s19, %s4183_s18 }
   0x8   : > { %s4267_s27 = scalar_select %p86_p1, %s4191_s20, %s88_s25  }
   0x9   : > { %p97_p5 = por %p96_p2, %p95_p0  ;;  %p4269_p6 = por %p151_p3, %p95_p0 }
   0xa   : > { %p157_p7 = scmp.eq.s32.totalorder %s3373_s23, 1  ;;  %p5394_p9 = scmp.ge.s32.totalorder %s4195_s21, 2 }
   0xc   : > { %p4273_p8 = por %p157_p7, %p156_p4  ;;  %182 = sbr.rel (%p5394_p9) target bundleno = 149 (0x95), region = 28 }
  0x11   : > { %185 = sbr.rel (!%p97_p5) target bundleno = 149 (0x95), region = 32  ;;  %s187_s30 = sand.u32 (%p97_p5), 1, %s4191_s20  }
  0x12   : > { %s3708_s6 = sshll.u32 (%p97_p5), %s4195_s21, 4  ;;  %s3376_s7 = sshll.u32 (%p97_p5), %s187_s30, 11 }
  0x13   : > { %s4285_s10 = scalar_lea.vmem (%p97_p5), %s5391_s3, %s3708_s6  ;;  %s4290_s11 = scalar_lea.vmem (%p97_p5), [#allocation2], %s3376_s7 }
  0x14   : > { %v205_v0 = vld [vmem:[%s4285_s10] sm:$0xff] (%p97_p5)  ;;  %v207_v1 = vld [vmem:[%s4285_s10 + $0x8] sm:$0xff] (%p97_p5) }
  0x15   : > { %v209_v2 = vld [vmem:[%s4285_s10 + $0x20] sm:$0xff] (%p97_p5)  ;;  %206 = vst [vmem:[%s4290_s11] sm:$0xff] (%p97_p5), %v205_v0  ;;  %208 = vst [vmem:[%s4290_s11 + $0x8] sm:$0xff] (%p97_p5), %v207_v1  ;;  %v211_v3 = vld [vmem:[%s4285_s10 + $0x28] sm:$0xff] (%p97_p5) }
  0x16   : > { %210 = vst [vmem:[%s4290_s11 + $0x10] sm:$0xff] %v209_v2  ;;  %v213_v4 = vld [vmem:[%s4285_s10 + $0x40] sm:$0xff]  ;;  %v215_v5 = vld [vmem:[%s4285_s10 + $0x48] sm:$0xff]  ;;  %212 = vst [vmem:[%s4290_s11 + $0x18] sm:$0xff] %v211_v3 }
  0x17   : > { %214 = vst [vmem:[%s4290_s11 + $0x20] sm:$0xff] %v213_v4  ;;  %216 = vst [vmem:[%s4290_s11 + $0x28] sm:$0xff] %v215_v5  ;;  %v217_v6 = vld [vmem:[%s4285_s10 + $0x60] sm:$0xff]  ;;  %v219_v7 = vld [vmem:[%s4285_s10 + $0x68] sm:$0xff] }
  0x18   : > { %v221_v8 = vld [vmem:[%s4285_s10 + $0x80] sm:$0xff]  ;;  %218 = vst [vmem:[%s4290_s11 + $0x30] sm:$0xff] %v217_v6  ;;  %220 = vst [vmem:[%s4290_s11 + $0x38] sm:$0xff] %v219_v7  ;;  %v223_v9 = vld [vmem:[%s4285_s10 + $0x88] sm:$0xff] }
  0x19   : > { %222 = vst [vmem:[%s4290_s11 + $0x40] sm:$0xff] %v221_v8  ;;  %v225_v10 = vld [vmem:[%s4285_s10 + $0xa0] sm:$0xff]  ;;  %v227_v11 = vld [vmem:[%s4285_s10 + $0xa8] sm:$0xff]  ;;  %224 = vst [vmem:[%s4290_s11 + $0x48] sm:$0xff] %v223_v9 }
  0x1a   : > { %226 = vst [vmem:[%s4290_s11 + $0x50] sm:$0xff] %v225_v10  ;;  %228 = vst [vmem:[%s4290_s11 + $0x58] sm:$0xff] %v227_v11  ;;  %v229_v12 = vld [vmem:[%s4285_s10 + $0xc0] sm:$0xff]  ;;  %v231_v13 = vld [vmem:[%s4285_s10 + $0xc8] sm:$0xff] }
  0x1b   : > { %v233_v14 = vld [vmem:[%s4285_s10 + $0xe0] sm:$0xff]  ;;  %230 = vst [vmem:[%s4290_s11 + $0x60] sm:$0xff] %v229_v12  ;;  %232 = vst [vmem:[%s4290_s11 + $0x68] sm:$0xff] %v231_v13  ;;  %v235_v15 = vld [vmem:[%s4285_s10 + $0xe8] sm:$0xff] }
  0x1c   : > { %234 = vst [vmem:[%s4290_s11 + $0x70] sm:$0xff] %v233_v14  ;;  %v237_v16 = vld [vmem:[%s4285_s10 + $0x100] sm:$0xff]  ;;  %v239_v17 = vld [vmem:[%s4285_s10 + $0x108] sm:$0xff]  ;;  %236 = vst [vmem:[%s4290_s11 + $0x78] sm:$0xff] %v235_v15 }
  0x1d   : > { %238 = vst [vmem:[%s4290_s11 + $0x80] sm:$0xff] %v237_v16  ;;  %240 = vst [vmem:[%s4290_s11 + $0x88] sm:$0xff] %v239_v17  ;;  %v241_v18 = vld [vmem:[%s4285_s10 + $0x120] sm:$0xff]  ;;  %v243_v19 = vld [vmem:[%s4285_s10 + $0x128] sm:$0xff] }
  0x1e   : > { %v245_v20 = vld [vmem:[%s4285_s10 + $0x140] sm:$0xff]  ;;  %242 = vst [vmem:[%s4290_s11 + $0x90] sm:$0xff] %v241_v18  ;;  %244 = vst [vmem:[%s4290_s11 + $0x98] sm:$0xff] %v243_v19  ;;  %v247_v21 = vld [vmem:[%s4285_s10 + $0x148] sm:$0xff] }
  0x1f   : > { %246 = vst [vmem:[%s4290_s11 + $0xa0] sm:$0xff] %v245_v20  ;;  %v249_v22 = vld [vmem:[%s4285_s10 + $0x160] sm:$0xff]  ;;  %v251_v23 = vld [vmem:[%s4285_s10 + $0x168] sm:$0xff]  ;;  %248 = vst [vmem:[%s4290_s11 + $0xa8] sm:$0xff] %v247_v21 }
  0x20   : > { %250 = vst [vmem:[%s4290_s11 + $0xb0] sm:$0xff] %v249_v22  ;;  %252 = vst [vmem:[%s4290_s11 + $0xb8] sm:$0xff] %v251_v23  ;;  %v253_v24 = vld [vmem:[%s4285_s10 + $0x180] sm:$0xff]  ;;  %v255_v25 = vld [vmem:[%s4285_s10 + $0x188] sm:$0xff] }
  0x21   : > { %v257_v26 = vld [vmem:[%s4285_s10 + $0x1a0] sm:$0xff]  ;;  %254 = vst [vmem:[%s4290_s11 + $0xc0] sm:$0xff] %v253_v24  ;;  %256 = vst [vmem:[%s4290_s11 + $0xc8] sm:$0xff] %v255_v25  ;;  %v259_v27 = vld [vmem:[%s4285_s10 + $0x1a8] sm:$0xff] }
  0x22   : > { %258 = vst [vmem:[%s4290_s11 + $0xd0] sm:$0xff] %v257_v26  ;;  %v261_v28 = vld [vmem:[%s4285_s10 + $0x1c0] sm:$0xff]  ;;  %v263_v29 = vld [vmem:[%s4285_s10 + $0x1c8] sm:$0xff]  ;;  %260 = vst [vmem:[%s4290_s11 + $0xd8] sm:$0xff] %v259_v27 }
  0x23   : > { %262 = vst [vmem:[%s4290_s11 + $0xe0] sm:$0xff] %v261_v28  ;;  %264 = vst [vmem:[%s4290_s11 + $0xe8] sm:$0xff] %v263_v29  ;;  %v265_v30 = vld [vmem:[%s4285_s10 + $0x1e0] sm:$0xff]  ;;  %v267_v31 = vld [vmem:[%s4285_s10 + $0x1e8] sm:$0xff] }
  0x24   : > { %v269_v32 = vld [vmem:[%s4285_s10 + $0x200] sm:$0xff]  ;;  %266 = vst [vmem:[%s4290_s11 + $0xf0] sm:$0xff] %v265_v30  ;;  %268 = vst [vmem:[%s4290_s11 + $0xf8] sm:$0xff] %v267_v31  ;;  %v271_v33 = vld [vmem:[%s4285_s10 + $0x208] sm:$0xff] }
  0x25   : > { %270 = vst [vmem:[%s4290_s11 + $0x100] sm:$0xff] %v269_v32  ;;  %v273_v34 = vld [vmem:[%s4285_s10 + $0x220] sm:$0xff]  ;;  %v275_v35 = vld [vmem:[%s4285_s10 + $0x228] sm:$0xff]  ;;  %272 = vst [vmem:[%s4290_s11 + $0x108] sm:$0xff] %v271_v33 }
  0x26   : > { %274 = vst [vmem:[%s4290_s11 + $0x110] sm:$0xff] %v273_v34  ;;  %276 = vst [vmem:[%s4290_s11 + $0x118] sm:$0xff] %v275_v35  ;;  %v277_v36 = vld [vmem:[%s4285_s10 + $0x240] sm:$0xff]  ;;  %v279_v37 = vld [vmem:[%s4285_s10 + $0x248] sm:$0xff] }
  0x27   : > { %v281_v38 = vld [vmem:[%s4285_s10 + $0x260] sm:$0xff]  ;;  %278 = vst [vmem:[%s4290_s11 + $0x120] sm:$0xff] %v277_v36  ;;  %280 = vst [vmem:[%s4290_s11 + $0x128] sm:$0xff] %v279_v37  ;;  %v283_v39 = vld [vmem:[%s4285_s10 + $0x268] sm:$0xff] }
  0x28   : > { %282 = vst [vmem:[%s4290_s11 + $0x130] sm:$0xff] %v281_v38  ;;  %v285_v40 = vld [vmem:[%s4285_s10 + $0x280] sm:$0xff]  ;;  %v287_v41 = vld [vmem:[%s4285_s10 + $0x288] sm:$0xff]  ;;  %284 = vst [vmem:[%s4290_s11 + $0x138] sm:$0xff] %v283_v39 }
  0x29   : > { %286 = vst [vmem:[%s4290_s11 + $0x140] sm:$0xff] %v285_v40  ;;  %288 = vst [vmem:[%s4290_s11 + $0x148] sm:$0xff] %v287_v41  ;;  %v289_v42 = vld [vmem:[%s4285_s10 + $0x2a0] sm:$0xff]  ;;  %v291_v43 = vld [vmem:[%s4285_s10 + $0x2a8] sm:$0xff] }
  0x2a   : > { %v293_v44 = vld [vmem:[%s4285_s10 + $0x2c0] sm:$0xff]  ;;  %290 = vst [vmem:[%s4290_s11 + $0x150] sm:$0xff] %v289_v42  ;;  %292 = vst [vmem:[%s4290_s11 + $0x158] sm:$0xff] %v291_v43  ;;  %v295_v45 = vld [vmem:[%s4285_s10 + $0x2c8] sm:$0xff] }
  0x2b   : > { %294 = vst [vmem:[%s4290_s11 + $0x160] sm:$0xff] %v293_v44  ;;  %v297_v46 = vld [vmem:[%s4285_s10 + $0x2e0] sm:$0xff]  ;;  %v299_v47 = vld [vmem:[%s4285_s10 + $0x2e8] sm:$0xff]  ;;  %296 = vst [vmem:[%s4290_s11 + $0x168] sm:$0xff] %v295_v45 }
  0x2c   : > { %298 = vst [vmem:[%s4290_s11 + $0x170] sm:$0xff] %v297_v46  ;;  %300 = vst [vmem:[%s4290_s11 + $0x178] sm:$0xff] %v299_v47  ;;  %v301_v48 = vld [vmem:[%s4285_s10 + $0x300] sm:$0xff]  ;;  %v303_v49 = vld [vmem:[%s4285_s10 + $0x308] sm:$0xff] }
  0x2d   : > { %v305_v50 = vld [vmem:[%s4285_s10 + $0x320] sm:$0xff]  ;;  %302 = vst [vmem:[%s4290_s11 + $0x180] sm:$0xff] %v301_v48  ;;  %304 = vst [vmem:[%s4290_s11 + $0x188] sm:$0xff] %v303_v49  ;;  %v307_v51 = vld [vmem:[%s4285_s10 + $0x328] sm:$0xff] }
  0x2e   : > { %306 = vst [vmem:[%s4290_s11 + $0x190] sm:$0xff] %v305_v50  ;;  %v309_v52 = vld [vmem:[%s4285_s10 + $0x340] sm:$0xff]  ;;  %v311_v53 = vld [vmem:[%s4285_s10 + $0x348] sm:$0xff]  ;;  %308 = vst [vmem:[%s4290_s11 + $0x198] sm:$0xff] %v307_v51 }
  0x2f   : > { %310 = vst [vmem:[%s4290_s11 + $0x1a0] sm:$0xff] %v309_v52  ;;  %312 = vst [vmem:[%s4290_s11 + $0x1a8] sm:$0xff] %v311_v53  ;;  %v313_v54 = vld [vmem:[%s4285_s10 + $0x360] sm:$0xff]  ;;  %v315_v55 = vld [vmem:[%s4285_s10 + $0x368] sm:$0xff] }
  0x30   : > { %v317_v56 = vld [vmem:[%s4285_s10 + $0x380] sm:$0xff]  ;;  %314 = vst [vmem:[%s4290_s11 + $0x1b0] sm:$0xff] %v313_v54  ;;  %316 = vst [vmem:[%s4290_s11 + $0x1b8] sm:$0xff] %v315_v55  ;;  %v319_v57 = vld [vmem:[%s4285_s10 + $0x388] sm:$0xff] }
  0x31   : > { %318 = vst [vmem:[%s4290_s11 + $0x1c0] sm:$0xff] %v317_v56  ;;  %v321_v58 = vld [vmem:[%s4285_s10 + $0x3a0] sm:$0xff]  ;;  %v323_v59 = vld [vmem:[%s4285_s10 + $0x3a8] sm:$0xff]  ;;  %320 = vst [vmem:[%s4290_s11 + $0x1c8] sm:$0xff] %v319_v57 }
  0x32   : > { %322 = vst [vmem:[%s4290_s11 + $0x1d0] sm:$0xff] %v321_v58  ;;  %324 = vst [vmem:[%s4290_s11 + $0x1d8] sm:$0xff] %v323_v59  ;;  %v325_v60 = vld [vmem:[%s4285_s10 + $0x3c0] sm:$0xff]  ;;  %v327_v61 = vld [vmem:[%s4285_s10 + $0x3c8] sm:$0xff] }
  0x33   : > { %v329_v62 = vld [vmem:[%s4285_s10 + $0x3e0] sm:$0xff]  ;;  %326 = vst [vmem:[%s4290_s11 + $0x1e0] sm:$0xff] %v325_v60  ;;  %328 = vst [vmem:[%s4290_s11 + $0x1e8] sm:$0xff] %v327_v61  ;;  %v331_v63 = vld [vmem:[%s4285_s10 + $0x3e8] sm:$0xff] }
  0x34   : > { %330 = vst [vmem:[%s4290_s11 + $0x1f0] sm:$0xff] %v329_v62  ;;  %v333_v0 = vld [vmem:[%s4285_s10 + $0x400] sm:$0xff]  ;;  %v335_v1 = vld [vmem:[%s4285_s10 + $0x408] sm:$0xff]  ;;  %332 = vst [vmem:[%s4290_s11 + $0x1f8] sm:$0xff] %v331_v63 }
  0x35   : > { %334 = vst [vmem:[%s4290_s11 + $0x200] sm:$0xff] %v333_v0  ;;  %336 = vst [vmem:[%s4290_s11 + $0x208] sm:$0xff] %v335_v1  ;;  %v337_v2 = vld [vmem:[%s4285_s10 + $0x420] sm:$0xff]  ;;  %v339_v3 = vld [vmem:[%s4285_s10 + $0x428] sm:$0xff] }
  0x36   : > { %v341_v4 = vld [vmem:[%s4285_s10 + $0x440] sm:$0xff]  ;;  %338 = vst [vmem:[%s4290_s11 + $0x210] sm:$0xff] %v337_v2  ;;  %340 = vst [vmem:[%s4290_s11 + $0x218] sm:$0xff] %v339_v3  ;;  %v343_v5 = vld [vmem:[%s4285_s10 + $0x448] sm:$0xff] }
  0x37   : > { %342 = vst [vmem:[%s4290_s11 + $0x220] sm:$0xff] %v341_v4  ;;  %v345_v6 = vld [vmem:[%s4285_s10 + $0x460] sm:$0xff]  ;;  %v347_v7 = vld [vmem:[%s4285_s10 + $0x468] sm:$0xff]  ;;  %344 = vst [vmem:[%s4290_s11 + $0x228] sm:$0xff] %v343_v5 }
  0x38   : > { %346 = vst [vmem:[%s4290_s11 + $0x230] sm:$0xff] %v345_v6  ;;  %348 = vst [vmem:[%s4290_s11 + $0x238] sm:$0xff] %v347_v7  ;;  %v349_v8 = vld [vmem:[%s4285_s10 + $0x480] sm:$0xff]  ;;  %v351_v9 = vld [vmem:[%s4285_s10 + $0x488] sm:$0xff] }
  0x39   : > { %v353_v10 = vld [vmem:[%s4285_s10 + $0x4a0] sm:$0xff]  ;;  %350 = vst [vmem:[%s4290_s11 + $0x240] sm:$0xff] %v349_v8  ;;  %352 = vst [vmem:[%s4290_s11 + $0x248] sm:$0xff] %v351_v9  ;;  %v355_v11 = vld [vmem:[%s4285_s10 + $0x4a8] sm:$0xff] }
  0x3a   : > { %354 = vst [vmem:[%s4290_s11 + $0x250] sm:$0xff] %v353_v10  ;;  %v357_v12 = vld [vmem:[%s4285_s10 + $0x4c0] sm:$0xff]  ;;  %v359_v13 = vld [vmem:[%s4285_s10 + $0x4c8] sm:$0xff]  ;;  %356 = vst [vmem:[%s4290_s11 + $0x258] sm:$0xff] %v355_v11 }
  0x3b   : > { %358 = vst [vmem:[%s4290_s11 + $0x260] sm:$0xff] %v357_v12  ;;  %360 = vst [vmem:[%s4290_s11 + $0x268] sm:$0xff] %v359_v13  ;;  %v361_v14 = vld [vmem:[%s4285_s10 + $0x4e0] sm:$0xff]  ;;  %v363_v15 = vld [vmem:[%s4285_s10 + $0x4e8] sm:$0xff] }
  0x3c   : > { %v365_v16 = vld [vmem:[%s4285_s10 + $0x500] sm:$0xff]  ;;  %362 = vst [vmem:[%s4290_s11 + $0x270] sm:$0xff] %v361_v14  ;;  %364 = vst [vmem:[%s4290_s11 + $0x278] sm:$0xff] %v363_v15  ;;  %v367_v17 = vld [vmem:[%s4285_s10 + $0x508] sm:$0xff] }
  0x3d   : > { %366 = vst [vmem:[%s4290_s11 + $0x280] sm:$0xff] %v365_v16  ;;  %v369_v18 = vld [vmem:[%s4285_s10 + $0x520] sm:$0xff]  ;;  %v371_v19 = vld [vmem:[%s4285_s10 + $0x528] sm:$0xff]  ;;  %368 = vst [vmem:[%s4290_s11 + $0x288] sm:$0xff] %v367_v17 }
  0x3e   : > { %370 = vst [vmem:[%s4290_s11 + $0x290] sm:$0xff] %v369_v18  ;;  %372 = vst [vmem:[%s4290_s11 + $0x298] sm:$0xff] %v371_v19  ;;  %v373_v20 = vld [vmem:[%s4285_s10 + $0x540] sm:$0xff]  ;;  %v375_v21 = vld [vmem:[%s4285_s10 + $0x548] sm:$0xff] }
  0x3f   : > { %v377_v22 = vld [vmem:[%s4285_s10 + $0x560] sm:$0xff]  ;;  %374 = vst [vmem:[%s4290_s11 + $0x2a0] sm:$0xff] %v373_v20  ;;  %376 = vst [vmem:[%s4290_s11 + $0x2a8] sm:$0xff] %v375_v21  ;;  %v379_v23 = vld [vmem:[%s4285_s10 + $0x568] sm:$0xff] }
  0x40   : > { %378 = vst [vmem:[%s4290_s11 + $0x2b0] sm:$0xff] %v377_v22  ;;  %v381_v24 = vld [vmem:[%s4285_s10 + $0x580] sm:$0xff]  ;;  %v383_v25 = vld [vmem:[%s4285_s10 + $0x588] sm:$0xff]  ;;  %380 = vst [vmem:[%s4290_s11 + $0x2b8] sm:$0xff] %v379_v23 }
  0x41   : > { %382 = vst [vmem:[%s4290_s11 + $0x2c0] sm:$0xff] %v381_v24  ;;  %384 = vst [vmem:[%s4290_s11 + $0x2c8] sm:$0xff] %v383_v25  ;;  %v385_v26 = vld [vmem:[%s4285_s10 + $0x5a0] sm:$0xff]  ;;  %v387_v27 = vld [vmem:[%s4285_s10 + $0x5a8] sm:$0xff] }
  0x42   : > { %v389_v28 = vld [vmem:[%s4285_s10 + $0x5c0] sm:$0xff]  ;;  %386 = vst [vmem:[%s4290_s11 + $0x2d0] sm:$0xff] %v385_v26  ;;  %388 = vst [vmem:[%s4290_s11 + $0x2d8] sm:$0xff] %v387_v27  ;;  %v391_v29 = vld [vmem:[%s4285_s10 + $0x5c8] sm:$0xff] }
  0x43   : > { %390 = vst [vmem:[%s4290_s11 + $0x2e0] sm:$0xff] %v389_v28  ;;  %v393_v30 = vld [vmem:[%s4285_s10 + $0x5e0] sm:$0xff]  ;;  %v395_v31 = vld [vmem:[%s4285_s10 + $0x5e8] sm:$0xff]  ;;  %392 = vst [vmem:[%s4290_s11 + $0x2e8] sm:$0xff] %v391_v29 }
  0x44   : > { %394 = vst [vmem:[%s4290_s11 + $0x2f0] sm:$0xff] %v393_v30  ;;  %396 = vst [vmem:[%s4290_s11 + $0x2f8] sm:$0xff] %v395_v31  ;;  %v397_v32 = vld [vmem:[%s4285_s10 + $0x600] sm:$0xff]  ;;  %v399_v33 = vld [vmem:[%s4285_s10 + $0x608] sm:$0xff] }
  0x45   : > { %v401_v34 = vld [vmem:[%s4285_s10 + $0x620] sm:$0xff]  ;;  %398 = vst [vmem:[%s4290_s11 + $0x300] sm:$0xff] %v397_v32  ;;  %400 = vst [vmem:[%s4290_s11 + $0x308] sm:$0xff] %v399_v33  ;;  %v403_v35 = vld [vmem:[%s4285_s10 + $0x628] sm:$0xff] }
  0x46   : > { %402 = vst [vmem:[%s4290_s11 + $0x310] sm:$0xff] %v401_v34  ;;  %v405_v36 = vld [vmem:[%s4285_s10 + $0x640] sm:$0xff]  ;;  %v407_v37 = vld [vmem:[%s4285_s10 + $0x648] sm:$0xff]  ;;  %404 = vst [vmem:[%s4290_s11 + $0x318] sm:$0xff] %v403_v35 }
  0x47   : > { %406 = vst [vmem:[%s4290_s11 + $0x320] sm:$0xff] %v405_v36  ;;  %408 = vst [vmem:[%s4290_s11 + $0x328] sm:$0xff] %v407_v37  ;;  %v409_v38 = vld [vmem:[%s4285_s10 + $0x660] sm:$0xff]  ;;  %v411_v39 = vld [vmem:[%s4285_s10 + $0x668] sm:$0xff] }
  0x48   : > { %v413_v40 = vld [vmem:[%s4285_s10 + $0x680] sm:$0xff]  ;;  %410 = vst [vmem:[%s4290_s11 + $0x330] sm:$0xff] %v409_v38  ;;  %412 = vst [vmem:[%s4290_s11 + $0x338] sm:$0xff] %v411_v39  ;;  %v415_v41 = vld [vmem:[%s4285_s10 + $0x688] sm:$0xff] }
  0x49   : > { %414 = vst [vmem:[%s4290_s11 + $0x340] sm:$0xff] %v413_v40  ;;  %v417_v42 = vld [vmem:[%s4285_s10 + $0x6a0] sm:$0xff]  ;;  %v419_v43 = vld [vmem:[%s4285_s10 + $0x6a8] sm:$0xff]  ;;  %416 = vst [vmem:[%s4290_s11 + $0x348] sm:$0xff] %v415_v41 }
  0x4a   : > { %418 = vst [vmem:[%s4290_s11 + $0x350] sm:$0xff] %v417_v42  ;;  %420 = vst [vmem:[%s4290_s11 + $0x358] sm:$0xff] %v419_v43  ;;  %v421_v44 = vld [vmem:[%s4285_s10 + $0x6c0] sm:$0xff]  ;;  %v423_v45 = vld [vmem:[%s4285_s10 + $0x6c8] sm:$0xff] }
  0x4b   : > { %v425_v46 = vld [vmem:[%s4285_s10 + $0x6e0] sm:$0xff]  ;;  %422 = vst [vmem:[%s4290_s11 + $0x360] sm:$0xff] %v421_v44  ;;  %424 = vst [vmem:[%s4290_s11 + $0x368] sm:$0xff] %v423_v45  ;;  %v427_v47 = vld [vmem:[%s4285_s10 + $0x6e8] sm:$0xff] }
  0x4c   : > { %426 = vst [vmem:[%s4290_s11 + $0x370] sm:$0xff] %v425_v46  ;;  %v429_v48 = vld [vmem:[%s4285_s10 + $0x700] sm:$0xff]  ;;  %v431_v49 = vld [vmem:[%s4285_s10 + $0x708] sm:$0xff]  ;;  %428 = vst [vmem:[%s4290_s11 + $0x378] sm:$0xff] %v427_v47 }
  0x4d   : > { %430 = vst [vmem:[%s4290_s11 + $0x380] sm:$0xff] %v429_v48  ;;  %432 = vst [vmem:[%s4290_s11 + $0x388] sm:$0xff] %v431_v49  ;;  %v433_v50 = vld [vmem:[%s4285_s10 + $0x720] sm:$0xff]  ;;  %v435_v51 = vld [vmem:[%s4285_s10 + $0x728] sm:$0xff] }
  0x4e   : > { %v437_v52 = vld [vmem:[%s4285_s10 + $0x740] sm:$0xff]  ;;  %434 = vst [vmem:[%s4290_s11 + $0x390] sm:$0xff] %v433_v50  ;;  %436 = vst [vmem:[%s4290_s11 + $0x398] sm:$0xff] %v435_v51  ;;  %v439_v53 = vld [vmem:[%s4285_s10 + $0x748] sm:$0xff] }
  0x4f   : > { %438 = vst [vmem:[%s4290_s11 + $0x3a0] sm:$0xff] %v437_v52  ;;  %v441_v54 = vld [vmem:[%s4285_s10 + $0x760] sm:$0xff]  ;;  %v443_v55 = vld [vmem:[%s4285_s10 + $0x768] sm:$0xff]  ;;  %440 = vst [vmem:[%s4290_s11 + $0x3a8] sm:$0xff] %v439_v53 }
  0x50   : > { %442 = vst [vmem:[%s4290_s11 + $0x3b0] sm:$0xff] %v441_v54  ;;  %444 = vst [vmem:[%s4290_s11 + $0x3b8] sm:$0xff] %v443_v55  ;;  %v445_v56 = vld [vmem:[%s4285_s10 + $0x780] sm:$0xff]  ;;  %v447_v57 = vld [vmem:[%s4285_s10 + $0x788] sm:$0xff] }
  0x51   : > { %v449_v58 = vld [vmem:[%s4285_s10 + $0x7a0] sm:$0xff]  ;;  %446 = vst [vmem:[%s4290_s11 + $0x3c0] sm:$0xff] %v445_v56  ;;  %448 = vst [vmem:[%s4290_s11 + $0x3c8] sm:$0xff] %v447_v57  ;;  %v451_v59 = vld [vmem:[%s4285_s10 + $0x7a8] sm:$0xff] }
  0x52   : > { %450 = vst [vmem:[%s4290_s11 + $0x3d0] sm:$0xff] %v449_v58  ;;  %v453_v60 = vld [vmem:[%s4285_s10 + $0x7c0] sm:$0xff]  ;;  %v455_v61 = vld [vmem:[%s4285_s10 + $0x7c8] sm:$0xff]  ;;  %452 = vst [vmem:[%s4290_s11 + $0x3d8] sm:$0xff] %v451_v59 }
  0x53   : > { %454 = vst [vmem:[%s4290_s11 + $0x3e0] sm:$0xff] %v453_v60  ;;  %456 = vst [vmem:[%s4290_s11 + $0x3e8] sm:$0xff] %v455_v61  ;;  %v457_v62 = vld [vmem:[%s4285_s10 + $0x7e0] sm:$0xff]  ;;  %v459_v63 = vld [vmem:[%s4285_s10 + $0x7e8] sm:$0xff] }
  0x54   : > { %v461_v0 = vld [vmem:[%s4285_s10 + $0x800] sm:$0xff]  ;;  %458 = vst [vmem:[%s4290_s11 + $0x3f0] sm:$0xff] %v457_v62  ;;  %460 = vst [vmem:[%s4290_s11 + $0x3f8] sm:$0xff] %v459_v63  ;;  %v463_v1 = vld [vmem:[%s4285_s10 + $0x808] sm:$0xff] }
  0x55   : > { %462 = vst [vmem:[%s4290_s11 + $0x400] sm:$0xff] %v461_v0  ;;  %v465_v2 = vld [vmem:[%s4285_s10 + $0x820] sm:$0xff]  ;;  %v467_v3 = vld [vmem:[%s4285_s10 + $0x828] sm:$0xff]  ;;  %464 = vst [vmem:[%s4290_s11 + $0x408] sm:$0xff] %v463_v1 }
  0x56   : > { %466 = vst [vmem:[%s4290_s11 + $0x410] sm:$0xff] %v465_v2  ;;  %468 = vst [vmem:[%s4290_s11 + $0x418] sm:$0xff] %v467_v3  ;;  %v469_v4 = vld [vmem:[%s4285_s10 + $0x840] sm:$0xff]  ;;  %v471_v5 = vld [vmem:[%s4285_s10 + $0x848] sm:$0xff] }
  0x57   : > { %v473_v6 = vld [vmem:[%s4285_s10 + $0x860] sm:$0xff]  ;;  %470 = vst [vmem:[%s4290_s11 + $0x420] sm:$0xff] %v469_v4  ;;  %472 = vst [vmem:[%s4290_s11 + $0x428] sm:$0xff] %v471_v5  ;;  %v475_v7 = vld [vmem:[%s4285_s10 + $0x868] sm:$0xff] }
  0x58   : > { %474 = vst [vmem:[%s4290_s11 + $0x430] sm:$0xff] %v473_v6  ;;  %v477_v8 = vld [vmem:[%s4285_s10 + $0x880] sm:$0xff]  ;;  %v479_v9 = vld [vmem:[%s4285_s10 + $0x888] sm:$0xff]  ;;  %476 = vst [vmem:[%s4290_s11 + $0x438] sm:$0xff] %v475_v7 }
  0x59   : > { %478 = vst [vmem:[%s4290_s11 + $0x440] sm:$0xff] %v477_v8  ;;  %480 = vst [vmem:[%s4290_s11 + $0x448] sm:$0xff] %v479_v9  ;;  %v481_v10 = vld [vmem:[%s4285_s10 + $0x8a0] sm:$0xff]  ;;  %v483_v11 = vld [vmem:[%s4285_s10 + $0x8a8] sm:$0xff] }
  0x5a   : > { %v485_v12 = vld [vmem:[%s4285_s10 + $0x8c0] sm:$0xff]  ;;  %482 = vst [vmem:[%s4290_s11 + $0x450] sm:$0xff] %v481_v10  ;;  %484 = vst [vmem:[%s4290_s11 + $0x458] sm:$0xff] %v483_v11  ;;  %v487_v13 = vld [vmem:[%s4285_s10 + $0x8c8] sm:$0xff] }
  0x5b   : > { %486 = vst [vmem:[%s4290_s11 + $0x460] sm:$0xff] %v485_v12  ;;  %v489_v14 = vld [vmem:[%s4285_s10 + $0x8e0] sm:$0xff]  ;;  %v491_v15 = vld [vmem:[%s4285_s10 + $0x8e8] sm:$0xff]  ;;  %488 = vst [vmem:[%s4290_s11 + $0x468] sm:$0xff] %v487_v13 }
  0x5c   : > { %490 = vst [vmem:[%s4290_s11 + $0x470] sm:$0xff] %v489_v14  ;;  %492 = vst [vmem:[%s4290_s11 + $0x478] sm:$0xff] %v491_v15  ;;  %v493_v16 = vld [vmem:[%s4285_s10 + $0x900] sm:$0xff]  ;;  %v495_v17 = vld [vmem:[%s4285_s10 + $0x908] sm:$0xff] }
  0x5d   : > { %v497_v18 = vld [vmem:[%s4285_s10 + $0x920] sm:$0xff]  ;;  %494 = vst [vmem:[%s4290_s11 + $0x480] sm:$0xff] %v493_v16  ;;  %496 = vst [vmem:[%s4290_s11 + $0x488] sm:$0xff] %v495_v17  ;;  %v499_v19 = vld [vmem:[%s4285_s10 + $0x928] sm:$0xff] }
  0x5e   : > { %498 = vst [vmem:[%s4290_s11 + $0x490] sm:$0xff] %v497_v18  ;;  %v501_v20 = vld [vmem:[%s4285_s10 + $0x940] sm:$0xff]  ;;  %v503_v21 = vld [vmem:[%s4285_s10 + $0x948] sm:$0xff]  ;;  %500 = vst [vmem:[%s4290_s11 + $0x498] sm:$0xff] %v499_v19 }
  0x5f   : > { %502 = vst [vmem:[%s4290_s11 + $0x4a0] sm:$0xff] %v501_v20  ;;  %504 = vst [vmem:[%s4290_s11 + $0x4a8] sm:$0xff] %v503_v21  ;;  %v505_v22 = vld [vmem:[%s4285_s10 + $0x960] sm:$0xff]  ;;  %v507_v23 = vld [vmem:[%s4285_s10 + $0x968] sm:$0xff] }
  0x60   : > { %v509_v24 = vld [vmem:[%s4285_s10 + $0x980] sm:$0xff]  ;;  %506 = vst [vmem:[%s4290_s11 + $0x4b0] sm:$0xff] %v505_v22  ;;  %508 = vst [vmem:[%s4290_s11 + $0x4b8] sm:$0xff] %v507_v23  ;;  %v511_v25 = vld [vmem:[%s4285_s10 + $0x988] sm:$0xff] }
  0x61   : > { %510 = vst [vmem:[%s4290_s11 + $0x4c0] sm:$0xff] %v509_v24  ;;  %v513_v26 = vld [vmem:[%s4285_s10 + $0x9a0] sm:$0xff]  ;;  %v515_v27 = vld [vmem:[%s4285_s10 + $0x9a8] sm:$0xff]  ;;  %512 = vst [vmem:[%s4290_s11 + $0x4c8] sm:$0xff] %v511_v25 }
  0x62   : > { %514 = vst [vmem:[%s4290_s11 + $0x4d0] sm:$0xff] %v513_v26  ;;  %516 = vst [vmem:[%s4290_s11 + $0x4d8] sm:$0xff] %v515_v27  ;;  %v517_v28 = vld [vmem:[%s4285_s10 + $0x9c0] sm:$0xff]  ;;  %v519_v29 = vld [vmem:[%s4285_s10 + $0x9c8] sm:$0xff] }
  0x63   : > { %v521_v30 = vld [vmem:[%s4285_s10 + $0x9e0] sm:$0xff]  ;;  %518 = vst [vmem:[%s4290_s11 + $0x4e0] sm:$0xff] %v517_v28  ;;  %520 = vst [vmem:[%s4290_s11 + $0x4e8] sm:$0xff] %v519_v29  ;;  %v523_v31 = vld [vmem:[%s4285_s10 + $0x9e8] sm:$0xff] }
  0x64   : > { %522 = vst [vmem:[%s4290_s11 + $0x4f0] sm:$0xff] %v521_v30  ;;  %v525_v32 = vld [vmem:[%s4285_s10 + $0xa00] sm:$0xff]  ;;  %v527_v33 = vld [vmem:[%s4285_s10 + $0xa08] sm:$0xff]  ;;  %524 = vst [vmem:[%s4290_s11 + $0x4f8] sm:$0xff] %v523_v31 }
  0x65   : > { %526 = vst [vmem:[%s4290_s11 + $0x500] sm:$0xff] %v525_v32  ;;  %528 = vst [vmem:[%s4290_s11 + $0x508] sm:$0xff] %v527_v33  ;;  %v529_v34 = vld [vmem:[%s4285_s10 + $0xa20] sm:$0xff]  ;;  %v531_v35 = vld [vmem:[%s4285_s10 + $0xa28] sm:$0xff] }
  0x66   : > { %v533_v36 = vld [vmem:[%s4285_s10 + $0xa40] sm:$0xff]  ;;  %530 = vst [vmem:[%s4290_s11 + $0x510] sm:$0xff] %v529_v34  ;;  %532 = vst [vmem:[%s4290_s11 + $0x518] sm:$0xff] %v531_v35  ;;  %v535_v37 = vld [vmem:[%s4285_s10 + $0xa48] sm:$0xff] }
  0x67   : > { %534 = vst [vmem:[%s4290_s11 + $0x520] sm:$0xff] %v533_v36  ;;  %v537_v38 = vld [vmem:[%s4285_s10 + $0xa60] sm:$0xff]  ;;  %v539_v39 = vld [vmem:[%s4285_s10 + $0xa68] sm:$0xff]  ;;  %536 = vst [vmem:[%s4290_s11 + $0x528] sm:$0xff] %v535_v37 }
  0x68   : > { %538 = vst [vmem:[%s4290_s11 + $0x530] sm:$0xff] %v537_v38  ;;  %540 = vst [vmem:[%s4290_s11 + $0x538] sm:$0xff] %v539_v39  ;;  %v541_v40 = vld [vmem:[%s4285_s10 + $0xa80] sm:$0xff]  ;;  %v543_v41 = vld [vmem:[%s4285_s10 + $0xa88] sm:$0xff] }
  0x69   : > { %v545_v42 = vld [vmem:[%s4285_s10 + $0xaa0] sm:$0xff]  ;;  %542 = vst [vmem:[%s4290_s11 + $0x540] sm:$0xff] %v541_v40  ;;  %544 = vst [vmem:[%s4290_s11 + $0x548] sm:$0xff] %v543_v41  ;;  %v547_v43 = vld [vmem:[%s4285_s10 + $0xaa8] sm:$0xff] }
  0x6a   : > { %546 = vst [vmem:[%s4290_s11 + $0x550] sm:$0xff] %v545_v42  ;;  %v549_v44 = vld [vmem:[%s4285_s10 + $0xac0] sm:$0xff]  ;;  %v551_v45 = vld [vmem:[%s4285_s10 + $0xac8] sm:$0xff]  ;;  %548 = vst [vmem:[%s4290_s11 + $0x558] sm:$0xff] %v547_v43 }
  0x6b   : > { %550 = vst [vmem:[%s4290_s11 + $0x560] sm:$0xff] %v549_v44  ;;  %552 = vst [vmem:[%s4290_s11 + $0x568] sm:$0xff] %v551_v45  ;;  %v553_v46 = vld [vmem:[%s4285_s10 + $0xae0] sm:$0xff]  ;;  %v555_v47 = vld [vmem:[%s4285_s10 + $0xae8] sm:$0xff] }
  0x6c   : > { %v557_v48 = vld [vmem:[%s4285_s10 + $0xb00] sm:$0xff]  ;;  %554 = vst [vmem:[%s4290_s11 + $0x570] sm:$0xff] %v553_v46  ;;  %556 = vst [vmem:[%s4290_s11 + $0x578] sm:$0xff] %v555_v47  ;;  %v559_v49 = vld [vmem:[%s4285_s10 + $0xb08] sm:$0xff] }
  0x6d   : > { %558 = vst [vmem:[%s4290_s11 + $0x580] sm:$0xff] %v557_v48  ;;  %v561_v50 = vld [vmem:[%s4285_s10 + $0xb20] sm:$0xff]  ;;  %v563_v51 = vld [vmem:[%s4285_s10 + $0xb28] sm:$0xff]  ;;  %560 = vst [vmem:[%s4290_s11 + $0x588] sm:$0xff] %v559_v49 }
  0x6e   : > { %562 = vst [vmem:[%s4290_s11 + $0x590] sm:$0xff] %v561_v50  ;;  %564 = vst [vmem:[%s4290_s11 + $0x598] sm:$0xff] %v563_v51  ;;  %v565_v52 = vld [vmem:[%s4285_s10 + $0xb40] sm:$0xff]  ;;  %v567_v53 = vld [vmem:[%s4285_s10 + $0xb48] sm:$0xff] }
  0x6f   : > { %v569_v54 = vld [vmem:[%s4285_s10 + $0xb60] sm:$0xff]  ;;  %566 = vst [vmem:[%s4290_s11 + $0x5a0] sm:$0xff] %v565_v52  ;;  %568 = vst [vmem:[%s4290_s11 + $0x5a8] sm:$0xff] %v567_v53  ;;  %v571_v55 = vld [vmem:[%s4285_s10 + $0xb68] sm:$0xff] }
  0x70   : > { %570 = vst [vmem:[%s4290_s11 + $0x5b0] sm:$0xff] %v569_v54  ;;  %v573_v56 = vld [vmem:[%s4285_s10 + $0xb80] sm:$0xff]  ;;  %v575_v57 = vld [vmem:[%s4285_s10 + $0xb88] sm:$0xff]  ;;  %572 = vst [vmem:[%s4290_s11 + $0x5b8] sm:$0xff] %v571_v55 }
  0x71   : > { %574 = vst [vmem:[%s4290_s11 + $0x5c0] sm:$0xff] %v573_v56  ;;  %576 = vst [vmem:[%s4290_s11 + $0x5c8] sm:$0xff] %v575_v57  ;;  %v577_v58 = vld [vmem:[%s4285_s10 + $0xba0] sm:$0xff]  ;;  %v579_v59 = vld [vmem:[%s4285_s10 + $0xba8] sm:$0xff] }
  0x72   : > { %v581_v60 = vld [vmem:[%s4285_s10 + $0xbc0] sm:$0xff]  ;;  %578 = vst [vmem:[%s4290_s11 + $0x5d0] sm:$0xff] %v577_v58  ;;  %580 = vst [vmem:[%s4290_s11 + $0x5d8] sm:$0xff] %v579_v59  ;;  %v583_v61 = vld [vmem:[%s4285_s10 + $0xbc8] sm:$0xff] }
  0x73   : > { %582 = vst [vmem:[%s4290_s11 + $0x5e0] sm:$0xff] %v581_v60  ;;  %v585_v62 = vld [vmem:[%s4285_s10 + $0xbe0] sm:$0xff]  ;;  %v587_v63 = vld [vmem:[%s4285_s10 + $0xbe8] sm:$0xff]  ;;  %584 = vst [vmem:[%s4290_s11 + $0x5e8] sm:$0xff] %v583_v61 }
  0x74   : > { %586 = vst [vmem:[%s4290_s11 + $0x5f0] sm:$0xff] %v585_v62  ;;  %588 = vst [vmem:[%s4290_s11 + $0x5f8] sm:$0xff] %v587_v63  ;;  %v589_v0 = vld [vmem:[%s4285_s10 + $0xc00] sm:$0xff]  ;;  %v591_v1 = vld [vmem:[%s4285_s10 + $0xc08] sm:$0xff] }
  0x75   : > { %v593_v2 = vld [vmem:[%s4285_s10 + $0xc20] sm:$0xff]  ;;  %590 = vst [vmem:[%s4290_s11 + $0x600] sm:$0xff] %v589_v0  ;;  %592 = vst [vmem:[%s4290_s11 + $0x608] sm:$0xff] %v591_v1  ;;  %v595_v3 = vld [vmem:[%s4285_s10 + $0xc28] sm:$0xff] }
  0x76   : > { %594 = vst [vmem:[%s4290_s11 + $0x610] sm:$0xff] %v593_v2  ;;  %v597_v4 = vld [vmem:[%s4285_s10 + $0xc40] sm:$0xff]  ;;  %v599_v5 = vld [vmem:[%s4285_s10 + $0xc48] sm:$0xff]  ;;  %596 = vst [vmem:[%s4290_s11 + $0x618] sm:$0xff] %v595_v3 }
  0x77   : > { %598 = vst [vmem:[%s4290_s11 + $0x620] sm:$0xff] %v597_v4  ;;  %600 = vst [vmem:[%s4290_s11 + $0x628] sm:$0xff] %v599_v5  ;;  %v601_v6 = vld [vmem:[%s4285_s10 + $0xc60] sm:$0xff]  ;;  %v603_v7 = vld [vmem:[%s4285_s10 + $0xc68] sm:$0xff] }
  0x78   : > { %v605_v8 = vld [vmem:[%s4285_s10 + $0xc80] sm:$0xff]  ;;  %602 = vst [vmem:[%s4290_s11 + $0x630] sm:$0xff] %v601_v6  ;;  %604 = vst [vmem:[%s4290_s11 + $0x638] sm:$0xff] %v603_v7  ;;  %v607_v9 = vld [vmem:[%s4285_s10 + $0xc88] sm:$0xff] }
  0x79   : > { %606 = vst [vmem:[%s4290_s11 + $0x640] sm:$0xff] %v605_v8  ;;  %v609_v10 = vld [vmem:[%s4285_s10 + $0xca0] sm:$0xff]  ;;  %v611_v11 = vld [vmem:[%s4285_s10 + $0xca8] sm:$0xff]  ;;  %608 = vst [vmem:[%s4290_s11 + $0x648] sm:$0xff] %v607_v9 }
  0x7a   : > { %610 = vst [vmem:[%s4290_s11 + $0x650] sm:$0xff] %v609_v10  ;;  %612 = vst [vmem:[%s4290_s11 + $0x658] sm:$0xff] %v611_v11  ;;  %v613_v12 = vld [vmem:[%s4285_s10 + $0xcc0] sm:$0xff]  ;;  %v615_v13 = vld [vmem:[%s4285_s10 + $0xcc8] sm:$0xff] }
  0x7b   : > { %v617_v14 = vld [vmem:[%s4285_s10 + $0xce0] sm:$0xff]  ;;  %614 = vst [vmem:[%s4290_s11 + $0x660] sm:$0xff] %v613_v12  ;;  %616 = vst [vmem:[%s4290_s11 + $0x668] sm:$0xff] %v615_v13  ;;  %v619_v15 = vld [vmem:[%s4285_s10 + $0xce8] sm:$0xff] }
  0x7c   : > { %618 = vst [vmem:[%s4290_s11 + $0x670] sm:$0xff] %v617_v14  ;;  %v621_v16 = vld [vmem:[%s4285_s10 + $0xd00] sm:$0xff]  ;;  %v623_v17 = vld [vmem:[%s4285_s10 + $0xd08] sm:$0xff]  ;;  %620 = vst [vmem:[%s4290_s11 + $0x678] sm:$0xff] %v619_v15 }
  0x7d   : > { %622 = vst [vmem:[%s4290_s11 + $0x680] sm:$0xff] %v621_v16  ;;  %624 = vst [vmem:[%s4290_s11 + $0x688] sm:$0xff] %v623_v17  ;;  %v625_v18 = vld [vmem:[%s4285_s10 + $0xd20] sm:$0xff]  ;;  %v627_v19 = vld [vmem:[%s4285_s10 + $0xd28] sm:$0xff] }
  0x7e   : > { %v629_v20 = vld [vmem:[%s4285_s10 + $0xd40] sm:$0xff]  ;;  %626 = vst [vmem:[%s4290_s11 + $0x690] sm:$0xff] %v625_v18  ;;  %628 = vst [vmem:[%s4290_s11 + $0x698] sm:$0xff] %v627_v19  ;;  %v631_v21 = vld [vmem:[%s4285_s10 + $0xd48] sm:$0xff] }
  0x7f   : > { %630 = vst [vmem:[%s4290_s11 + $0x6a0] sm:$0xff] %v629_v20  ;;  %v633_v22 = vld [vmem:[%s4285_s10 + $0xd60] sm:$0xff]  ;;  %v635_v23 = vld [vmem:[%s4285_s10 + $0xd68] sm:$0xff]  ;;  %632 = vst [vmem:[%s4290_s11 + $0x6a8] sm:$0xff] %v631_v21 }
  0x80   : > { %634 = vst [vmem:[%s4290_s11 + $0x6b0] sm:$0xff] %v633_v22  ;;  %636 = vst [vmem:[%s4290_s11 + $0x6b8] sm:$0xff] %v635_v23  ;;  %v637_v24 = vld [vmem:[%s4285_s10 + $0xd80] sm:$0xff]  ;;  %v639_v25 = vld [vmem:[%s4285_s10 + $0xd88] sm:$0xff] }
  0x81   : > { %v641_v26 = vld [vmem:[%s4285_s10 + $0xda0] sm:$0xff]  ;;  %638 = vst [vmem:[%s4290_s11 + $0x6c0] sm:$0xff] %v637_v24  ;;  %640 = vst [vmem:[%s4290_s11 + $0x6c8] sm:$0xff] %v639_v25  ;;  %v643_v27 = vld [vmem:[%s4285_s10 + $0xda8] sm:$0xff] }
  0x82   : > { %642 = vst [vmem:[%s4290_s11 + $0x6d0] sm:$0xff] %v641_v26  ;;  %v645_v28 = vld [vmem:[%s4285_s10 + $0xdc0] sm:$0xff]  ;;  %v647_v29 = vld [vmem:[%s4285_s10 + $0xdc8] sm:$0xff]  ;;  %644 = vst [vmem:[%s4290_s11 + $0x6d8] sm:$0xff] %v643_v27 }
  0x83   : > { %646 = vst [vmem:[%s4290_s11 + $0x6e0] sm:$0xff] %v645_v28  ;;  %648 = vst [vmem:[%s4290_s11 + $0x6e8] sm:$0xff] %v647_v29  ;;  %v649_v30 = vld [vmem:[%s4285_s10 + $0xde0] sm:$0xff]  ;;  %v651_v31 = vld [vmem:[%s4285_s10 + $0xde8] sm:$0xff] }
  0x84   : > { %v653_v32 = vld [vmem:[%s4285_s10 + $0xe00] sm:$0xff]  ;;  %650 = vst [vmem:[%s4290_s11 + $0x6f0] sm:$0xff] %v649_v30  ;;  %652 = vst [vmem:[%s4290_s11 + $0x6f8] sm:$0xff] %v651_v31  ;;  %v655_v33 = vld [vmem:[%s4285_s10 + $0xe08] sm:$0xff] }
  0x85   : > { %654 = vst [vmem:[%s4290_s11 + $0x700] sm:$0xff] %v653_v32  ;;  %v657_v34 = vld [vmem:[%s4285_s10 + $0xe20] sm:$0xff]  ;;  %v659_v35 = vld [vmem:[%s4285_s10 + $0xe28] sm:$0xff]  ;;  %656 = vst [vmem:[%s4290_s11 + $0x708] sm:$0xff] %v655_v33 }
  0x86   : > { %658 = vst [vmem:[%s4290_s11 + $0x710] sm:$0xff] %v657_v34  ;;  %660 = vst [vmem:[%s4290_s11 + $0x718] sm:$0xff] %v659_v35  ;;  %v661_v36 = vld [vmem:[%s4285_s10 + $0xe40] sm:$0xff]  ;;  %v663_v37 = vld [vmem:[%s4285_s10 + $0xe48] sm:$0xff] }
  0x87   : > { %v665_v38 = vld [vmem:[%s4285_s10 + $0xe60] sm:$0xff]  ;;  %662 = vst [vmem:[%s4290_s11 + $0x720] sm:$0xff] %v661_v36  ;;  %664 = vst [vmem:[%s4290_s11 + $0x728] sm:$0xff] %v663_v37  ;;  %v667_v39 = vld [vmem:[%s4285_s10 + $0xe68] sm:$0xff] }
  0x88   : > { %666 = vst [vmem:[%s4290_s11 + $0x730] sm:$0xff] %v665_v38  ;;  %v669_v40 = vld [vmem:[%s4285_s10 + $0xe80] sm:$0xff]  ;;  %v671_v41 = vld [vmem:[%s4285_s10 + $0xe88] sm:$0xff]  ;;  %668 = vst [vmem:[%s4290_s11 + $0x738] sm:$0xff] %v667_v39 }
  0x89   : > { %670 = vst [vmem:[%s4290_s11 + $0x740] sm:$0xff] %v669_v40  ;;  %672 = vst [vmem:[%s4290_s11 + $0x748] sm:$0xff] %v671_v41  ;;  %v673_v42 = vld [vmem:[%s4285_s10 + $0xea0] sm:$0xff]  ;;  %v675_v43 = vld [vmem:[%s4285_s10 + $0xea8] sm:$0xff] }
  0x8a   : > { %v677_v44 = vld [vmem:[%s4285_s10 + $0xec0] sm:$0xff]  ;;  %674 = vst [vmem:[%s4290_s11 + $0x750] sm:$0xff] %v673_v42  ;;  %676 = vst [vmem:[%s4290_s11 + $0x758] sm:$0xff] %v675_v43  ;;  %v679_v45 = vld [vmem:[%s4285_s10 + $0xec8] sm:$0xff] }
  0x8b   : > { %678 = vst [vmem:[%s4290_s11 + $0x760] sm:$0xff] %v677_v44  ;;  %v681_v46 = vld [vmem:[%s4285_s10 + $0xee0] sm:$0xff]  ;;  %v683_v47 = vld [vmem:[%s4285_s10 + $0xee8] sm:$0xff]  ;;  %680 = vst [vmem:[%s4290_s11 + $0x768] sm:$0xff] %v679_v45 }
  0x8c   : > { %682 = vst [vmem:[%s4290_s11 + $0x770] sm:$0xff] %v681_v46  ;;  %684 = vst [vmem:[%s4290_s11 + $0x778] sm:$0xff] %v683_v47  ;;  %v685_v48 = vld [vmem:[%s4285_s10 + $0xf00] sm:$0xff]  ;;  %v687_v49 = vld [vmem:[%s4285_s10 + $0xf08] sm:$0xff] }
  0x8d   : > { %v689_v50 = vld [vmem:[%s4285_s10 + $0xf20] sm:$0xff]  ;;  %686 = vst [vmem:[%s4290_s11 + $0x780] sm:$0xff] %v685_v48  ;;  %688 = vst [vmem:[%s4290_s11 + $0x788] sm:$0xff] %v687_v49  ;;  %v691_v51 = vld [vmem:[%s4285_s10 + $0xf28] sm:$0xff] }
  0x8e   : > { %690 = vst [vmem:[%s4290_s11 + $0x790] sm:$0xff] %v689_v50  ;;  %v693_v52 = vld [vmem:[%s4285_s10 + $0xf40] sm:$0xff]  ;;  %v695_v53 = vld [vmem:[%s4285_s10 + $0xf48] sm:$0xff]  ;;  %692 = vst [vmem:[%s4290_s11 + $0x798] sm:$0xff] %v691_v51 }
  0x8f   : > { %694 = vst [vmem:[%s4290_s11 + $0x7a0] sm:$0xff] %v693_v52  ;;  %696 = vst [vmem:[%s4290_s11 + $0x7a8] sm:$0xff] %v695_v53  ;;  %v697_v54 = vld [vmem:[%s4285_s10 + $0xf60] sm:$0xff]  ;;  %v699_v55 = vld [vmem:[%s4285_s10 + $0xf68] sm:$0xff] }
  0x90   : > { %v701_v56 = vld [vmem:[%s4285_s10 + $0xf80] sm:$0xff]  ;;  %698 = vst [vmem:[%s4290_s11 + $0x7b0] sm:$0xff] %v697_v54  ;;  %700 = vst [vmem:[%s4290_s11 + $0x7b8] sm:$0xff] %v699_v55  ;;  %v703_v57 = vld [vmem:[%s4285_s10 + $0xf88] sm:$0xff] }
  0x91   : > { %702 = vst [vmem:[%s4290_s11 + $0x7c0] sm:$0xff] %v701_v56  ;;  %v705_v58 = vld [vmem:[%s4285_s10 + $0xfa0] sm:$0xff]  ;;  %v707_v59 = vld [vmem:[%s4285_s10 + $0xfa8] sm:$0xff]  ;;  %704 = vst [vmem:[%s4290_s11 + $0x7c8] sm:$0xff] %v703_v57 }
  0x92   : > { %706 = vst [vmem:[%s4290_s11 + $0x7d0] sm:$0xff] %v705_v58  ;;  %708 = vst [vmem:[%s4290_s11 + $0x7d8] sm:$0xff] %v707_v59  ;;  %v709_v60 = vld [vmem:[%s4285_s10 + $0xfc0] sm:$0xff]  ;;  %v711_v61 = vld [vmem:[%s4285_s10 + $0xfc8] sm:$0xff] }
  0x93   : > { %v713_v62 = vld [vmem:[%s4285_s10 + $0xfe0] sm:$0xff]  ;;  %710 = vst [vmem:[%s4290_s11 + $0x7e0] sm:$0xff] %v709_v60  ;;  %712 = vst [vmem:[%s4290_s11 + $0x7e8] sm:$0xff] %v711_v61  ;;  %v715_v63 = vld [vmem:[%s4285_s10 + $0xfe8] sm:$0xff] }
  0x94   : > { %714 = vst [vmem:[%s4290_s11 + $0x7f0] sm:$0xff] %v713_v62  ;;  %716 = vst [vmem:[%s4290_s11 + $0x7f8] sm:$0xff] %v715_v63 }
  0x95 PF: > { %p3379_p10 = scmp.ge.s32.totalorder %s4195_s21, 1  ;;  %p729_p11 = scmp.lt.s32.totalorder %s4195_s21, 3 }
  0x97   : > { %p730_p12 = pnand %p3379_p10, %p729_p11 }
  0x98   : > { %s4872_s8 = sand.u32 (!%p730_p12), 1, %s4187_s19   ;;  %s3382_s15 = sshll.u32 (!%p730_p12), %s4251_s22, 2 }
  0x99   : > { %733 = sbr.rel (%p730_p12) target bundleno = 804 (0x324), region = 59  ;;  %s3380_s13 = sshll.u32 (!%p730_p12), %s4872_s8, 11 }
  0x9a   : > { %s4896_s9 = scalar_lea.vmem (!%p730_p12), [#allocation2], %s3380_s13  ;;  %p769_p13 = scmp.lt.s32.totalorder (!%p730_p12), %s3382_s15, 7 }
  0x9b   : > { %s3709_s23 = sshll.u32 (!%p730_p12), %s4251_s22, 7  ;;  %s3285_s10 = scalar_lea.sflag (!%p730_p12), [#allocation4], %s4872_s8 }
  0x9c   : > { %s3297_s7 = scalar_lea.hbm (!%p730_p12), %s5393_s5, %s3709_s23  ;;  %s4199_s12 = smov (!%p730_p12), [#allocation3]  }
  0x9d   : > { %s4139_s14 = sshll.u32 (!%p730_p12), %s4199_s12, 4  ;;  %s4140_s14 = int_to_ptr.vmem [resolvable:$false] %s4139_s14 }
  0x9e   : > { %v833_v0 = vld [vmem:[%s5389_s1 + $0x1c0] sm:$0xff]  ;;  %v834_v2 = vld [vmem:[%s5389_s1 + $0x1c8] sm:$0xff]  ;;  %v4197_v8 = vmov 0   ;;  %v835_v62 = vld [vmem:[%s5389_s1 + $0x1d0] sm:$0xff]  ;;  %s5403_s15 = smov (!%p769_p13, %s3382_s15), 7  ;;  %s4141_s22 = scalar_lea.vmem %s4140_s14, 256 }
  0x9f   : > { %v837_v1 = vld [vmem:[%s5389_s1 + $0x1e0] sm:$0xff]  ;;  %v838_v4 = vld [vmem:[%s5389_s1 + $0x1e8] sm:$0xff]  ;;  %1235 = vmatprep.mubr.bf16.mxu0 %v4197_v8  ;;  %1276 = vmatprep.mubr.bf16.mxu1 %v4197_v8  ;;  %s771_s17 = scalar_lea.vmem %s5392_s4, %s5403_s15 }
  0xa0   : > { %v3440_v3 = vcombine.high %v833_v0, %v837_v1  ;;  %v3439_v5 = vcombine.low %v833_v0, %v837_v1  ;;  %v825_v6 = vld [vmem:[%s5389_s1 + $0x180] sm:$0xff]  ;;  %v3442_v9 = vcombine.high %v834_v2, %v838_v4  ;;  %v3441_v10 = vcombine.low %v834_v2, %v838_v4  ;;  %v826_v12 = vld [vmem:[%s5389_s1 + $0x188] sm:$0xff]  ;;  %v839_v0 = vld [vmem:[%s5389_s1 + $0x1f0] sm:$0xff] }
  0xa1   : > { %v829_v7 = vld [vmem:[%s5389_s1 + $0x1a0] sm:$0xff]  ;;  %v830_v13 = vld [vmem:[%s5389_s1 + $0x1a8] sm:$0xff]  ;;  %v836_v1 = vld [vmem:[%s5389_s1 + $0x1d8] sm:$0xff] }
  0xa2   : > { %v3432_v11 = vcombine.high %v825_v6, %v829_v7  ;;  %v817_v14 = vld [vmem:[%s5389_s1 + $0x140] sm:$0xff]  ;;  %1203 = vmatprep.subr.bf16.mxu0 %v3440_v3  ;;  %v3434_v15 = vcombine.high %v826_v12, %v830_v13  ;;  %v818_v17 = vld [vmem:[%s5389_s1 + $0x148] sm:$0xff]  ;;  %1244 = vmatprep.subr.bf16.mxu1 %v3442_v9  ;;  %v3431_v19 = vcombine.low %v825_v6, %v829_v7  ;;  %v840_v2 = vld [vmem:[%s5389_s1 + $0x1f8] sm:$0xff] }
  0xa3   : > { %v821_v16 = vld [vmem:[%s5389_s1 + $0x160] sm:$0xff]  ;;  %v822_v18 = vld [vmem:[%s5389_s1 + $0x168] sm:$0xff]  ;;  %1204 = vmatpush1.bf16.msra.mxu0 %v3439_v5  ;;  %1245 = vmatpush1.bf16.msra.mxu1 %v3441_v10  ;;  %v3433_v20 = vcombine.low %v826_v12, %v830_v13  ;;  %v3444_v6 = vcombine.high %v835_v62, %v839_v0  ;;  %v827_v7 = vld [vmem:[%s5389_s1 + $0x190] sm:$0xff]  ;;  %v3446_v9 = vcombine.high %v836_v1, %v840_v2 }
  0xa4   : > { %1205 = vmatprep.subr.bf16.mxu0 %v3432_v11  ;;  %v3424_v21 = vcombine.high %v817_v14, %v821_v16  ;;  %1246 = vmatprep.subr.bf16.mxu1 %v3434_v15  ;;  %v3426_v22 = vcombine.high %v818_v17, %v822_v18  ;;  %v809_v23 = vld [vmem:[%s5389_s1 + $0x100] sm:$0xff]  ;;  %v810_v25 = vld [vmem:[%s5389_s1 + $0x108] sm:$0xff]  ;;  %v3423_v27 = vcombine.low %v817_v14, %v821_v16  ;;  %v831_v10 = vld [vmem:[%s5389_s1 + $0x1b0] sm:$0xff] }
  0xa5   : > { %v813_v24 = vld [vmem:[%s5389_s1 + $0x120] sm:$0xff]  ;;  %v814_v26 = vld [vmem:[%s5389_s1 + $0x128] sm:$0xff]  ;;  %v3425_v28 = vcombine.low %v818_v17, %v822_v18  ;;  %v828_v11 = vld [vmem:[%s5389_s1 + $0x198] sm:$0xff]  ;;  %v3443_v14 = vcombine.low %v835_v62, %v839_v0  ;;  %v3445_v15 = vcombine.low %v836_v1, %v840_v2  ;;  %v3436_v16 = vcombine.high %v827_v7, %v831_v10 }
  0xa6   : > { %v3416_v29 = vcombine.high %v809_v23, %v813_v24  ;;  %v3418_v30 = vcombine.high %v810_v25, %v814_v26  ;;  %v801_v31 = vld [vmem:[%s5389_s1 + $0xc0] sm:$0xff]  ;;  %v802_v33 = vld [vmem:[%s5389_s1 + $0xc8] sm:$0xff]  ;;  %v3415_v35 = vcombine.low %v809_v23, %v813_v24  ;;  %v3417_v36 = vcombine.low %v810_v25, %v814_v26  ;;  %v832_v13 = vld [vmem:[%s5389_s1 + $0x1b8] sm:$0xff] }
  0xa7   : > { %1206 = vmatpush1.bf16.msra.mxu0 %v3431_v19  ;;  %1247 = vmatpush1.bf16.msra.mxu1 %v3433_v20  ;;  %v805_v32 = vld [vmem:[%s5389_s1 + $0xe0] sm:$0xff]  ;;  %v806_v34 = vld [vmem:[%s5389_s1 + $0xe8] sm:$0xff]  ;;  %v819_v17 = vld [vmem:[%s5389_s1 + $0x150] sm:$0xff]  ;;  %v3438_v18 = vcombine.high %v828_v11, %v832_v13  ;;  %v3437_v23 = vcombine.low %v828_v11, %v832_v13 }
  0xa8   : > { %1207 = vmatprep.subr.bf16.mxu0 %v3424_v21  ;;  %1248 = vmatprep.subr.bf16.mxu1 %v3426_v22  ;;  %v3408_v37 = vcombine.high %v801_v31, %v805_v32  ;;  %v3410_v38 = vcombine.high %v802_v33, %v806_v34  ;;  %v793_v39 = vld [vmem:[%s5389_s1 + $0x80] sm:$0xff]  ;;  %v794_v41 = vld [vmem:[%s5389_s1 + $0x88] sm:$0xff]  ;;  %v3407_v43 = vcombine.low %v801_v31, %v805_v32  ;;  %v823_v19 = vld [vmem:[%s5389_s1 + $0x170] sm:$0xff] }
  0xa9   : > { %v797_v40 = vld [vmem:[%s5389_s1 + $0xa0] sm:$0xff]  ;;  %v798_v42 = vld [vmem:[%s5389_s1 + $0xa8] sm:$0xff]  ;;  %v3409_v44 = vcombine.low %v802_v33, %v806_v34  ;;  %v820_v20 = vld [vmem:[%s5389_s1 + $0x158] sm:$0xff]  ;;  %v3435_v22 = vcombine.low %v827_v7, %v831_v10  ;;  %v3428_v24 = vcombine.high %v819_v17, %v823_v19 }
  0xaa   : > { %v3400_v45 = vcombine.high %v793_v39, %v797_v40  ;;  %v3402_v46 = vcombine.high %v794_v41, %v798_v42  ;;  %v785_v47 = vld [vmem:[%s5389_s1 + $0x40] sm:$0xff]  ;;  %v786_v49 = vld [vmem:[%s5389_s1 + $0x48] sm:$0xff]  ;;  %v3399_v51 = vcombine.low %v793_v39, %v797_v40  ;;  %v3401_v52 = vcombine.low %v794_v41, %v798_v42  ;;  %v824_v21 = vld [vmem:[%s5389_s1 + $0x178] sm:$0xff] }
  0xab   : > { %1208 = vmatpush1.bf16.msra.mxu0 %v3423_v27  ;;  %1249 = vmatpush1.bf16.msra.mxu1 %v3425_v28  ;;  %v789_v48 = vld [vmem:[%s5389_s1 + $0x60] sm:$0xff]  ;;  %v790_v50 = vld [vmem:[%s5389_s1 + $0x68] sm:$0xff]  ;;  %v811_v25 = vld [vmem:[%s5389_s1 + $0x110] sm:$0xff]  ;;  %v3430_v26 = vcombine.high %v820_v20, %v824_v21  ;;  %v3429_v31 = vcombine.low %v820_v20, %v824_v21 }
  0xac   : > { %1209 = vmatprep.subr.bf16.mxu0 %v3416_v29  ;;  %1250 = vmatprep.subr.bf16.mxu1 %v3418_v30  ;;  %v3392_v53 = vcombine.high %v785_v47, %v789_v48  ;;  %v777_v54 = vld [vmem:[%s5389_s1] sm:$0xff]  ;;  %v3394_v55 = vcombine.high %v786_v49, %v790_v50  ;;  %v778_v57 = vld [vmem:[%s5389_s1 + $0x8] sm:$0xff]  ;;  %v3391_v59 = vcombine.low %v785_v47, %v789_v48  ;;  %v815_v27 = vld [vmem:[%s5389_s1 + $0x130] sm:$0xff] }
  0xad   : > { %v781_v56 = vld [vmem:[%s5389_s1 + $0x20] sm:$0xff]  ;;  %v782_v58 = vld [vmem:[%s5389_s1 + $0x28] sm:$0xff]  ;;  %v3393_v60 = vcombine.low %v786_v49, %v790_v50  ;;  %v812_v28 = vld [vmem:[%s5389_s1 + $0x118] sm:$0xff]  ;;  %v3427_v30 = vcombine.low %v819_v17, %v823_v19  ;;  %v3420_v32 = vcombine.high %v811_v25, %v815_v27 }
  0xae   : > { %v3384_v61 = vcombine.high %v777_v54, %v781_v56  ;;  %v3386_v63 = vcombine.high %v778_v57, %v782_v58  ;;  %v3383_v3 = vcombine.low %v777_v54, %v781_v56  ;;  %v775_v4 = vld [vmem:[%s5388_s0] sm:$0x3]  ;;  %v3385_v5 = vcombine.low %v778_v57, %v782_v58  ;;  %v816_v29 = vld [vmem:[%s5389_s1 + $0x138] sm:$0xff]  ;;  %v803_v33 = vld [vmem:[%s5389_s1 + $0xd0] sm:$0xff] }
  0xaf   : > { %1210 = vmatpush1.bf16.msra.mxu0 %v3415_v35  ;;  %1251 = vmatpush1.bf16.msra.mxu1 %v3417_v36  ;;  %v4931_v12 = vpack.c.bf16 %v775_v4, %v775_v4  ;;  %v3422_v34 = vcombine.high %v812_v28, %v816_v29  ;;  %v807_v35 = vld [vmem:[%s5389_s1 + $0xf0] sm:$0xff]  ;;  %v808_v36 = vld [vmem:[%s5389_s1 + $0xf8] sm:$0xff] }
  0xb0   : > { %1211 = vmatprep.subr.bf16.mxu0 %v3408_v37  ;;  %1252 = vmatprep.subr.bf16.mxu1 %v3410_v38  ;;  %v3419_v37 = vcombine.low %v811_v25, %v815_v27  ;;  %v3421_v38 = vcombine.low %v812_v28, %v816_v29  ;;  %v3412_v39 = vcombine.high %v803_v33, %v807_v35  ;;  %v795_v40 = vld [vmem:[%s5389_s1 + $0x90] sm:$0xff] }
  0xb1   : > { %v799_v42 = vld [vmem:[%s5389_s1 + $0xb0] sm:$0xff] }
  0xb2   : > { %v3404_v47 = vcombine.high %v795_v40, %v799_v42  ;;  %v787_v48 = vld [vmem:[%s5389_s1 + $0x50] sm:$0xff] }
  0xb3   : > { %1212 = vmatpush1.bf16.msra.mxu0 %v3407_v43  ;;  %1253 = vmatpush1.bf16.msra.mxu1 %v3409_v44  ;;  %v796_v43 = vld [vmem:[%s5389_s1 + $0x98] sm:$0xff]  ;;  %v791_v50 = vld [vmem:[%s5389_s1 + $0x70] sm:$0xff] }
  0xb4   : > { %1213 = vmatprep.subr.bf16.mxu0 %v3400_v45  ;;  %1254 = vmatprep.subr.bf16.mxu1 %v3402_v46  ;;  %v800_v44 = vld [vmem:[%s5389_s1 + $0xb8] sm:$0xff]  ;;  %v3411_v45 = vcombine.low %v803_v33, %v807_v35  ;;  %v779_v56 = vld [vmem:[%s5389_s1 + $0x10] sm:$0xff] }
  0xb5   : > { %v3406_v49 = vcombine.high %v796_v43, %v800_v44  ;;  %v3405_v54 = vcombine.low %v796_v43, %v800_v44  ;;  %v783_v58 = vld [vmem:[%s5389_s1 + $0x30] sm:$0xff] }
  0xb6   : > { %v3387_v1 = vcombine.low %v779_v56, %v783_v58  ;;  %v3756_v4 = vld [vmem:[%s4896_s9 + $0x2e4] ss:$16 sps:$4 sm:$0xff]   ;;  %v3757_v10 = vld [vmem:[%s4896_s9 + $0xc0] ss:$16 sps:$4 sm:$0xff]  }
  0xb7   : > { %1214 = vmatpush1.bf16.msra.mxu0 %v3399_v51  ;;  %1255 = vmatpush1.bf16.msra.mxu1 %v3401_v52  ;;  %v788_v51 = vld [vmem:[%s5389_s1 + $0x58] sm:$0xff]  ;;  %v3759_v7 = vld [vmem:[%s4896_s9 + $0xc4] ss:$16 sps:$4 sm:$0xff]   ;;  %v3760_v11 = vld [vmem:[%s4896_s9 + $0x2c0] ss:$16 sps:$4 sm:$0xff]  }
  0xb8   : > { %1215 = vmatprep.subr.bf16.mxu0 %v3392_v53  ;;  %1256 = vmatprep.subr.bf16.mxu1 %v3394_v55  ;;  %v792_v52 = vld [vmem:[%s5389_s1 + $0x78] sm:$0xff]  ;;  %v3403_v53 = vcombine.low %v795_v40, %v799_v42  ;;  %v3396_v55 = vcombine.high %v787_v48, %v791_v50  ;;  %v3765_v13 = vld [vmem:[%s4896_s9 + $0xa4] ss:$16 sps:$4 sm:$0xff]   ;;  %v3772_v19 = vld [vmem:[%s4896_s9 + $0x280] ss:$16 sps:$4 sm:$0xff]  }
  0xb9   : > { %v3398_v57 = vcombine.high %v788_v51, %v792_v52  ;;  %v3397_v62 = vcombine.low %v788_v51, %v792_v52  ;;  %v3771_v17 = vld [vmem:[%s4896_s9 + $0x84] ss:$16 sps:$4 sm:$0xff]   ;;  %v3784_v27 = vld [vmem:[%s4896_s9 + $0x240] ss:$16 sps:$4 sm:$0xff]  }
  0xba   : > { %v3777_v20 = vld [vmem:[%s4896_s9 + $0x64] ss:$16 sps:$4 sm:$0xff]   ;;  %v3796_v35 = vld [vmem:[%s4896_s9 + $0x200] ss:$16 sps:$4 sm:$0xff]  }
  0xbb   : > { %1216 = vmatpush1.bf16.msra.mxu0 %v3391_v59  ;;  %1257 = vmatpush1.bf16.msra.mxu1 %v3393_v60  ;;  %v780_v59 = vld [vmem:[%s5389_s1 + $0x18] sm:$0xff]  ;;  %v3780_v21 = vld [vmem:[%s4896_s9 + $0x264] ss:$16 sps:$4 sm:$0xff]   ;;  %v3808_v42 = vld [vmem:[%s4896_s9 + $0x3c0] ss:$16 sps:$4 sm:$0xff]  }
  0xbc   : > { %1217 = vmatprep.subr.bf16.mxu0 %v3384_v61  ;;  %1258 = vmatprep.subr.bf16.mxu1 %v3386_v63  ;;  %v784_v60 = vld [vmem:[%s5389_s1 + $0x38] sm:$0xff]  ;;  %v3395_v61 = vcombine.low %v787_v48, %v791_v50  ;;  %v3388_v63 = vcombine.high %v779_v56, %v783_v58  ;;  %v3786_v25 = vld [vmem:[%s4896_s9 + $0x244] ss:$16 sps:$4 sm:$0xff]   ;;  %v3811_v44 = vld [vmem:[%s4896_s9 + $0x1a0] ss:$16 sps:$4 sm:$0xff]  }
  0xbd   : > { %v3390_v0 = vcombine.high %v780_v59, %v784_v60  ;;  %v3389_v2 = vcombine.low %v780_v59, %v784_v60  ;;  %v3789_v28 = vld [vmem:[%s4896_s9 + $0x24] ss:$16 sps:$4 sm:$0xff]   ;;  %v3817_v48 = vld [vmem:[%s4896_s9 + $0x180] ss:$16 sps:$4 sm:$0xff]  }
  0xbe   : > { %v3792_v29 = vld [vmem:[%s4896_s9 + $0x224] ss:$16 sps:$4 sm:$0xff]   ;;  %v3820_v50 = vld [vmem:[%s4896_s9 + $0x380] ss:$16 sps:$4 sm:$0xff]  }
  0xbf   : > { %1218 = vmatpush1.bf16.msra.mxu0 %v3383_v3  ;;  %1259 = vmatpush1.bf16.msra.mxu1 %v3385_v5  ;;  %v3753_v3 = vld [vmem:[%s4896_s9 + $0xe4] ss:$16 sps:$4 sm:$0xff]   ;;  %v3751_v5 = vld [vmem:[%s4896_s9 + $0xe0] ss:$16 sps:$4 sm:$0xff]  }
  0xc0   : > { %1285 = vmatprep.subr.bf16.mxu0 %v3444_v6  ;;  %1326 = vmatprep.subr.bf16.mxu1 %v3446_v9  ;;  %v3754_v6 = vld [vmem:[%s4896_s9 + $0x2e0] ss:$16 sps:$4 sm:$0xff]   ;;  %v3762_v9 = vld [vmem:[%s4896_s9 + $0x2c4] ss:$16 sps:$4 sm:$0xff]  }
  0xc1   : > { %v3798_v33 = vld [vmem:[%s4896_s9 + $0x204] ss:$16 sps:$4 sm:$0xff]   ;;  %v3823_v52 = vld [vmem:[%s4896_s9 + $0x160] ss:$16 sps:$4 sm:$0xff]  }
  0xc2   : > { %1236 = vmatmul.mubr.bf16.vlgmr.msra.gmra.mxu0 %v4931_v12  ;;  %1277 = vmatmul.mubr.bf16.vlgmr.msra.gmra.mxu1 %v4931_v12  ;;  %v3810_v40 = vld [vmem:[%s4896_s9 + $0x3c4] ss:$16 sps:$4 sm:$0xff]   ;;  %v3829_v56 = vld [vmem:[%s4896_s9 + $0x140] ss:$16 sps:$4 sm:$0xff]  }
  0xc3   : > { %1286 = vmatpush1.bf16.msra.mxu0 %v3443_v14  ;;  %1327 = vmatpush1.bf16.msra.mxu1 %v3445_v15  ;;  %v3768_v14 = vld [vmem:[%s4896_s9 + $0x2a4] ss:$16 sps:$4 sm:$0xff]   ;;  %v3763_v15 = vld [vmem:[%s4896_s9 + $0xa0] ss:$16 sps:$4 sm:$0xff]  }
  0xc4   : > { %1287 = vmatprep.subr.bf16.mxu0 %v3436_v16  ;;  %1328 = vmatprep.subr.bf16.mxu1 %v3438_v18  ;;  %v3766_v16 = vld [vmem:[%s4896_s9 + $0x2a0] ss:$16 sps:$4 sm:$0xff]   ;;  %v3774_v18 = vld [vmem:[%s4896_s9 + $0x284] ss:$16 sps:$4 sm:$0xff]  }
  0xc5   : > { %1317 = vmatprep.mubr.bf16.mxu0 %v4197_v8  ;;  %1358 = vmatprep.mubr.bf16.mxu1 %v4197_v8  ;;  %v804_v8 = vld [vmem:[%s5389_s1 + $0xd8] sm:$0xff]  ;;  %v3813_v43 = vld [vmem:[%s4896_s9 + $0x1a4] ss:$16 sps:$4 sm:$0xff]   ;;  %v3832_v58 = vld [vmem:[%s4896_s9 + $0x340] ss:$16 sps:$4 sm:$0xff]  }
  0xc6   : > { %v3414_v41 = vcombine.high %v804_v8, %v808_v36  ;;  %v3413_v46 = vcombine.low %v804_v8, %v808_v36  ;;  %v3801_v8 = vld [vmem:[%s4896_s9 + $0x1e4] ss:$16 sps:$4 sm:$0xff]   ;;  %v3835_v60 = vld [vmem:[%s4896_s9 + $0x120] ss:$16 sps:$4 sm:$0xff]  }
  0xc7   : > { %1288 = vmatpush1.bf16.msra.mxu0 %v3435_v22  ;;  %1329 = vmatpush1.bf16.msra.mxu1 %v3437_v23  ;;  %v3775_v22 = vld [vmem:[%s4896_s9 + $0x60] ss:$16 sps:$4 sm:$0xff]   ;;  %v3804_v36 = vld [vmem:[%s4896_s9 + $0x3e4] ss:$16 sps:$4 sm:$0xff]  }
  0xc8   : > { %1289 = vmatprep.subr.bf16.mxu0 %v3428_v24  ;;  %1330 = vmatprep.subr.bf16.mxu1 %v3430_v26  ;;  %v3778_v23 = vld [vmem:[%s4896_s9 + $0x260] ss:$16 sps:$4 sm:$0xff]   ;;  %v3783_v24 = vld [vmem:[%s4896_s9 + $0x44] ss:$16 sps:$4 sm:$0xff]  }
  0xc9   : > { %v3781_v26 = vld [vmem:[%s4896_s9 + $0x40] ss:$16 sps:$4 sm:$0xff]   ;;  %v3825_v51 = vld [vmem:[%s4896_s9 + $0x164] ss:$16 sps:$4 sm:$0xff]  }
  0xca   : > { %v3837_v59 = vld [vmem:[%s4896_s9 + $0x124] ss:$16 sps:$4 sm:$0xff]  }
  0xcb   : > { %1290 = vmatpush1.bf16.msra.mxu0 %v3427_v30  ;;  %1331 = vmatpush1.bf16.msra.mxu1 %v3429_v31  ;;  %v3787_v30 = vld [vmem:[%s4896_s9 + $0x20] ss:$16 sps:$4 sm:$0xff]  }
  0xcc   : > { %1291 = vmatprep.subr.bf16.mxu0 %v3420_v32  ;;  %1332 = vmatprep.subr.bf16.mxu1 %v3422_v34  ;;  %v3790_v31 = vld [vmem:[%s4896_s9 + $0x220] ss:$16 sps:$4 sm:$0xff]   ;;  %v3795_v32 = vld [vmem:[%s4896_s9 + $0x4] ss:$16 sps:$4 sm:$0xff]  }
  0xcd   : > { %v3793_v34 = vld [vmem:[%s4896_s9] ss:$16 sps:$4 sm:$0xff]  }
  0xcf   : > { %1292 = vmatpush1.bf16.msra.mxu0 %v3419_v37  ;;  %1333 = vmatpush1.bf16.msra.mxu1 %v3421_v38  ;;  %v3799_v37 = vld [vmem:[%s4896_s9 + $0x1e0] ss:$16 sps:$4 sm:$0xff]  }
  0xd0   : > { %1293 = vmatprep.subr.bf16.mxu0 %v3412_v39  ;;  %1334 = vmatprep.subr.bf16.mxu1 %v3414_v41  ;;  %v3802_v38 = vld [vmem:[%s4896_s9 + $0x3e0] ss:$16 sps:$4 sm:$0xff]   ;;  %v3807_v39 = vld [vmem:[%s4896_s9 + $0x1c4] ss:$16 sps:$4 sm:$0xff]  }
  0xd1   : > { %v3805_v41 = vld [vmem:[%s4896_s9 + $0x1c0] ss:$16 sps:$4 sm:$0xff]  }
  0xd3   : > { %1294 = vmatpush1.bf16.msra.mxu0 %v3411_v45  ;;  %1335 = vmatpush1.bf16.msra.mxu1 %v3413_v46  ;;  %v3816_v45 = vld [vmem:[%s4896_s9 + $0x3a4] ss:$16 sps:$4 sm:$0xff]   ;;  %v3814_v46 = vld [vmem:[%s4896_s9 + $0x3a0] ss:$16 sps:$4 sm:$0xff]  }
  0xd4   : > { %1295 = vmatprep.subr.bf16.mxu0 %v3404_v47  ;;  %1336 = vmatprep.subr.bf16.mxu1 %v3406_v49  ;;  %v3819_v47 = vld [vmem:[%s4896_s9 + $0x184] ss:$16 sps:$4 sm:$0xff]  }
  0xd5   : > { %v3822_v49 = vld [vmem:[%s4896_s9 + $0x384] ss:$16 sps:$4 sm:$0xff]  }
  0xd7   : > { %1296 = vmatpush1.bf16.msra.mxu0 %v3403_v53  ;;  %1337 = vmatpush1.bf16.msra.mxu1 %v3405_v54  ;;  %v3828_v53 = vld [vmem:[%s4896_s9 + $0x364] ss:$16 sps:$4 sm:$0xff]   ;;  %v3826_v54 = vld [vmem:[%s4896_s9 + $0x360] ss:$16 sps:$4 sm:$0xff]  }
  0xd8   : > { %1297 = vmatprep.subr.bf16.mxu0 %v3396_v55  ;;  %1338 = vmatprep.subr.bf16.mxu1 %v3398_v57  ;;  %v3831_v55 = vld [vmem:[%s4896_s9 + $0x144] ss:$16 sps:$4 sm:$0xff]  }
  0xd9   : > { %v3834_v57 = vld [vmem:[%s4896_s9 + $0x344] ss:$16 sps:$4 sm:$0xff]  }
  0xdb   : > { %1298 = vmatpush1.bf16.msra.mxu0 %v3395_v61  ;;  %1339 = vmatpush1.bf16.msra.mxu1 %v3397_v62  ;;  %v3840_v61 = vld [vmem:[%s4896_s9 + $0x324] ss:$16 sps:$4 sm:$0xff]   ;;  %v3838_v62 = vld [vmem:[%s4896_s9 + $0x320] ss:$16 sps:$4 sm:$0xff]  }
  0xdc   : > { %1299 = vmatprep.subr.bf16.mxu0 %v3388_v63  ;;  %1340 = vmatprep.subr.bf16.mxu1 %v3390_v0  ;;  %v3843_v63 = vld [vmem:[%s4896_s9 + $0x104] ss:$16 sps:$4 sm:$0xff]  }
  0xdd   : > { %v3846_v0 = vld [vmem:[%s4896_s9 + $0x304] ss:$16 sps:$4 sm:$0xff]  }
  0xdf   : > { %1300 = vmatpush1.bf16.msra.mxu0 %v3387_v1  ;;  %1341 = vmatpush1.bf16.msra.mxu1 %v3389_v2  ;;  %v3841_v1 = vld [vmem:[%s4896_s9 + $0x100] ss:$16 sps:$4 sm:$0xff]  }
  0xe0   : > { %2933 = vmatprep.subr.bf16.mxu0 %v3753_v3  ;;  %2974 = vmatprep.subr.bf16.mxu1 %v3756_v4  ;;  %v3844_v2 = vld [vmem:[%s4896_s9 + $0x300] ss:$16 sps:$4 sm:$0xff]   ;;  %v3849_v3 = vld [vmem:[%s4896_s9 + $0x4e4] ss:$16 sps:$4 sm:$0xff]  }
  0xe1   : > { %v3852_v4 = vld [vmem:[%s4896_s9 + $0x6e4] ss:$16 sps:$4 sm:$0xff]  }
  0xe2   : > { %1318 = vmatmul.mubr.bf16.vlgmr.msra.gmra.mxu0 %v4931_v12  ;;  %1359 = vmatmul.mubr.bf16.vlgmr.msra.gmra.mxu1 %v4931_v12  ;;  %v3769_v12 = vld [vmem:[%s4896_s9 + $0x80] ss:$16 sps:$4 sm:$0xff]  }
  0xe3   : > { %2934 = vmatpush1.bf16.msra.mxu0 %v3751_v5  ;;  %2975 = vmatpush1.bf16.msra.mxu1 %v3754_v6  ;;  %v843_v5 = vlaneseq }
  0xe4   : > { %2935 = vmatprep.subr.bf16.mxu0 %v3759_v7  ;;  %2976 = vmatprep.subr.bf16.mxu1 %v3762_v9 }
  0xe5   : > { %v5080_v6 = vshrl.u32 %v843_v5, 7 }
  0xe7   : > { %2936 = vmatpush1.bf16.msra.mxu0 %v3757_v10  ;;  %2977 = vmatpush1.bf16.msra.mxu1 %v3760_v11  ;;  %v845_v7 = vsub.s32 0, %v5080_v6  ;;  %v853_v9 = vsub.s32 2, %v5080_v6  ;;  %v5087_v10 = vld [vmem:[%s5390_s2] sm:$0xff]  ;;  %v849_v11 = vsub.s32 1, %v5080_v6 }
  0xe8   : > { %2937 = vmatprep.subr.bf16.mxu0 %v3765_v13  ;;  %2978 = vmatprep.subr.bf16.mxu1 %v3768_v14  ;;  %v857_v13 = vsub.s32 3, %v5080_v6 }
  0xe9   : > { %v846_v14 = vrot.slane %v5087_v10, %v845_v7 }
  0xeb   : > { %2938 = vmatpush1.bf16.msra.mxu0 %v3763_v15  ;;  %2979 = vmatpush1.bf16.msra.mxu1 %v3766_v16  ;;  %v854_v15 = vrot.slane %v5087_v10, %v853_v9  ;;  %v850_v16 = vrot.slane %v5087_v10, %v849_v11 }
  0xec   : > { %2939 = vmatprep.subr.bf16.mxu0 %v3771_v17  ;;  %2980 = vmatprep.subr.bf16.mxu1 %v3774_v18  ;;  %v858_v18 = vrot.slane %v5087_v10, %v857_v13 }
  0xef   : > { %2940 = vmatpush1.bf16.msra.mxu0 %v3769_v12  ;;  %2981 = vmatpush1.bf16.msra.mxu1 %v3772_v19 }
  0xf0   : > { %2941 = vmatprep.subr.bf16.mxu0 %v3777_v20  ;;  %2982 = vmatprep.subr.bf16.mxu1 %v3780_v21 }
  0xf3   : > { %2942 = vmatpush1.bf16.msra.mxu0 %v3775_v22  ;;  %2983 = vmatpush1.bf16.msra.mxu1 %v3778_v23 }
  0xf4   : > { %2943 = vmatprep.subr.bf16.mxu0 %v3783_v24  ;;  %2984 = vmatprep.subr.bf16.mxu1 %v3786_v25 }
  0xf7   : > { %2944 = vmatpush1.bf16.msra.mxu0 %v3781_v26  ;;  %2985 = vmatpush1.bf16.msra.mxu1 %v3784_v27 }
  0xf8   : > { %2945 = vmatprep.subr.bf16.mxu0 %v3789_v28  ;;  %2986 = vmatprep.subr.bf16.mxu1 %v3792_v29  ;;  %v3847_v29 = vld [vmem:[%s4896_s9 + $0x4e0] ss:$16 sps:$4 sm:$0xff]  }
  0xfb   : > { %2946 = vmatpush1.bf16.msra.mxu0 %v3787_v30  ;;  %2987 = vmatpush1.bf16.msra.mxu1 %v3790_v31 }
  0xfc   : > { %2947 = vmatprep.subr.bf16.mxu0 %v3795_v32  ;;  %2988 = vmatprep.subr.bf16.mxu1 %v3798_v33  ;;  %v3850_v33 = vld [vmem:[%s4896_s9 + $0x6e0] ss:$16 sps:$4 sm:$0xff]  }
  0xff   : > { %2948 = vmatpush1.bf16.msra.mxu0 %v3793_v34  ;;  %2989 = vmatpush1.bf16.msra.mxu1 %v3796_v35  ;;  %v3855_v34 = vld [vmem:[%s4896_s9 + $0x4c4] ss:$16 sps:$4 sm:$0xff]  }
 0x100   : > { %2949 = vmatprep.subr.bf16.mxu0 %v3801_v8  ;;  %2990 = vmatprep.subr.bf16.mxu1 %v3804_v36  ;;  %v3858_v8 = vld [vmem:[%s4896_s9 + $0x6c4] ss:$16 sps:$4 sm:$0xff]   ;;  %v3853_v36 = vld [vmem:[%s4896_s9 + $0x4c0] ss:$16 sps:$4 sm:$0xff]  }
 0x103   : > { %2950 = vmatpush2.bf16.msra.mxu0 %v3799_v37  ;;  %2991 = vmatpush2.bf16.msra.mxu1 %v3802_v38  ;;  %v3856_v37 = vld [vmem:[%s4896_s9 + $0x6c0] ss:$16 sps:$4 sm:$0xff]   ;;  %v3861_v38 = vld [vmem:[%s4896_s9 + $0x4a4] ss:$16 sps:$4 sm:$0xff]  }
 0x104   : > { %2951 = vmatprep.subr.bf16.mxu0 %v3807_v39  ;;  %2992 = vmatprep.subr.bf16.mxu1 %v3810_v40  ;;  %v3864_v39 = vld [vmem:[%s4896_s9 + $0x6a4] ss:$16 sps:$4 sm:$0xff]   ;;  %v3859_v40 = vld [vmem:[%s4896_s9 + $0x4a0] ss:$16 sps:$4 sm:$0xff]  }
 0x107   : > { %2952 = vmatpush2.bf16.msra.mxu0 %v3805_v41  ;;  %2993 = vmatpush2.bf16.msra.mxu1 %v3808_v42  ;;  %v3862_v41 = vld [vmem:[%s4896_s9 + $0x6a0] ss:$16 sps:$4 sm:$0xff]   ;;  %v3867_v42 = vld [vmem:[%s4896_s9 + $0x484] ss:$16 sps:$4 sm:$0xff]  }
 0x108   : > { %2953 = vmatprep.subr.bf16.mxu0 %v3813_v43  ;;  %2994 = vmatprep.subr.bf16.mxu1 %v3816_v45  ;;  %v3870_v43 = vld [vmem:[%s4896_s9 + $0x684] ss:$16 sps:$4 sm:$0xff]   ;;  %v3868_v45 = vld [vmem:[%s4896_s9 + $0x680] ss:$16 sps:$4 sm:$0xff]  }
 0x10b   : > { %2954 = vmatpush2.bf16.msra.mxu0 %v3811_v44  ;;  %2995 = vmatpush2.bf16.msra.mxu1 %v3814_v46  ;;  %v3865_v44 = vld [vmem:[%s4896_s9 + $0x480] ss:$16 sps:$4 sm:$0xff]   ;;  %v3873_v46 = vld [vmem:[%s4896_s9 + $0x464] ss:$16 sps:$4 sm:$0xff]  }
 0x10c   : > { %2955 = vmatprep.subr.bf16.mxu0 %v3819_v47  ;;  %2996 = vmatprep.subr.bf16.mxu1 %v3822_v49  ;;  %v3876_v47 = vld [vmem:[%s4896_s9 + $0x664] ss:$16 sps:$4 sm:$0xff]   ;;  %v3874_v49 = vld [vmem:[%s4896_s9 + $0x660] ss:$16 sps:$4 sm:$0xff]  }
 0x10f   : > { %2956 = vmatpush2.bf16.msra.mxu0 %v3817_v48  ;;  %2997 = vmatpush2.bf16.msra.mxu1 %v3820_v50  ;;  %v3871_v48 = vld [vmem:[%s4896_s9 + $0x460] ss:$16 sps:$4 sm:$0xff]   ;;  %v3879_v50 = vld [vmem:[%s4896_s9 + $0x444] ss:$16 sps:$4 sm:$0xff]  }
 0x110   : > { %2957 = vmatprep.subr.bf16.mxu0 %v3825_v51  ;;  %2998 = vmatprep.subr.bf16.mxu1 %v3828_v53  ;;  %v3882_v51 = vld [vmem:[%s4896_s9 + $0x644] ss:$16 sps:$4 sm:$0xff]   ;;  %v3880_v53 = vld [vmem:[%s4896_s9 + $0x640] ss:$16 sps:$4 sm:$0xff]  }
 0x113   : > { %2958 = vmatpush2.bf16.msra.mxu0 %v3823_v52  ;;  %2999 = vmatpush2.bf16.msra.mxu1 %v3826_v54  ;;  %v3877_v52 = vld [vmem:[%s4896_s9 + $0x440] ss:$16 sps:$4 sm:$0xff]   ;;  %v3885_v54 = vld [vmem:[%s4896_s9 + $0x424] ss:$16 sps:$4 sm:$0xff]  }
 0x114   : > { %2959 = vmatprep.subr.bf16.mxu0 %v3831_v55  ;;  %3000 = vmatprep.subr.bf16.mxu1 %v3834_v57  ;;  %v3888_v55 = vld [vmem:[%s4896_s9 + $0x624] ss:$16 sps:$4 sm:$0xff]   ;;  %v873_v57 = vsub.s32 7, %v5080_v6 }
 0x117   : > { %2960 = vmatpush2.bf16.msra.mxu0 %v3829_v56  ;;  %3001 = vmatpush2.bf16.msra.mxu1 %v3832_v58  ;;  %v865_v56 = vsub.s32 5, %v5080_v6  ;;  %v3883_v58 = vld [vmem:[%s4896_s9 + $0x420] ss:$16 sps:$4 sm:$0xff]  }
 0x118   : > { %2961 = vmatprep.subr.bf16.mxu0 %v3837_v59  ;;  %3002 = vmatprep.subr.bf16.mxu1 %v3840_v61  ;;  %v3886_v59 = vld [vmem:[%s4896_s9 + $0x620] ss:$16 sps:$4 sm:$0xff]   ;;  %v3894_v61 = vld [vmem:[%s4896_s9 + $0x604] ss:$16 sps:$4 sm:$0xff]  }
 0x11b   : > { %2962 = vmatpush2.bf16.msra.mxu0 %v3835_v60  ;;  %3003 = vmatpush2.bf16.msra.mxu1 %v3838_v62  ;;  %v3891_v60 = vld [vmem:[%s4896_s9 + $0x404] ss:$16 sps:$4 sm:$0xff]   ;;  %v866_v62 = vrot.slane %v5087_v10, %v865_v56 }
 0x11c   : > { %2963 = vmatprep.subr.bf16.mxu0 %v3843_v63  ;;  %3004 = vmatprep.subr.bf16.mxu1 %v3846_v0  ;;  %v874_v0 = vrot.slane %v5087_v10, %v873_v57  ;;  %v3939_v56 = vld [vmem:[%s4896_s9 + $0x504] ss:$16 sps:$4 sm:$0xff]  }
 0x11d   : > { %v3942_v57 = vld [vmem:[%s4896_s9 + $0x704] ss:$16 sps:$4 sm:$0xff]  }
 0x11f   : > { %2964 = vmatpush2.bf16.msra.mxu0 %v3841_v1  ;;  %3005 = vmatpush2.bf16.msra.mxu1 %v3844_v2  ;;  %v3889_v1 = vld [vmem:[%s4896_s9 + $0x400] ss:$16 sps:$4 sm:$0xff]  }
 0x120   : > { %3015 = vmatprep.subr.bf16.mxu0 %v3849_v3  ;;  %3056 = vmatprep.subr.bf16.mxu1 %v3852_v4  ;;  %v3892_v3 = vld [vmem:[%s4896_s9 + $0x600] ss:$16 sps:$4 sm:$0xff]   ;;  %v3897_v4 = vld [vmem:[%s4896_s9 + $0x5e4] ss:$16 sps:$4 sm:$0xff]  }
 0x182   : > { %v1237_v17 = vpop.f32.mrf.mxu0  ;;  %v1278_v12 = vpop.f32.mrf.mxu1 }
 0x183   : > { %v1238_v19 = vadd.f32 %v1237_v17, %v846_v14  ;;  %v1279_v20 = vadd.f32 %v1278_v12, %v854_v15  ;;  %v3900_v14 = vld [vmem:[%s4896_s9 + $0x7e4] ss:$16 sps:$4 sm:$0xff]   ;;  %v3895_v12 = vld [vmem:[%s4896_s9 + $0x5e0] ss:$16 sps:$4 sm:$0xff]  }
 0x184   : > { %v1239_v21 = vpop.f32.mrf.mxu0  ;;  %v1280_v23 = vpop.f32.mrf.mxu1 }
 0x185   : > { %v1240_v22 = vadd.f32 %v1239_v21, %v850_v16  ;;  %v1281_v24 = vadd.f32 %v1280_v23, %v858_v18  ;;  %v5103_v26 = vpack.c.bf16 %v1279_v20, %v1279_v20  ;;  %v5108_v30 = vpack.c.bf16 %v1238_v19, %v1238_v19  ;;  %v3898_v21 = vld [vmem:[%s4896_s9 + $0x7e0] ss:$16 sps:$4 sm:$0xff]  }
 0x186   : > { %v1241_v25 = vpop.f32.mrf.mxu0  ;;  %v1282_v28 = vpop.f32.mrf.mxu1 }
 0x187   : > { %v5105_v27 = vpack.c.bf16 %v1240_v22, %v1240_v22  ;;  %v5110_v31 = vpack.c.bf16 %v1281_v24, %v1281_v24  ;;  %v3903_v22 = vld [vmem:[%s4896_s9 + $0x5c4] ss:$16 sps:$4 sm:$0xff]  }
 0x188   : > { %v1242_v32 = vpop.f32.mrf.mxu0  ;;  %v1283_v35 = vpop.f32.mrf.mxu1  ;;  %v3906_v25 = vld [vmem:[%s4896_s9 + $0x7c4] ss:$16 sps:$4 sm:$0xff]  }
 0x189   : > { %2965 = vmatprep.mubr.bf16.mxu0 %v5105_v27  ;;  %3006 = vmatprep.mubr.bf16.mxu1 %v5110_v31  ;;  %v3904_v32 = vld [vmem:[%s4896_s9 + $0x7c0] ss:$16 sps:$4 sm:$0xff]  }
 0x18a   : > { %2966 = vmatmul.mubr.bf16.vlgmr.msra.gmra.mxu0 %v5108_v30  ;;  %3007 = vmatmul.mubr.bf16.vlgmr.msra.gmra.mxu1 %v5103_v26  ;;  %v3907_v35 = vld [vmem:[%s4896_s9 + $0x5a0] ss:$16 sps:$4 sm:$0xff]  }
 0x18b   : > { %3016 = vmatpush1.bf16.msra.mxu0 %v3847_v29  ;;  %3057 = vmatpush1.bf16.msra.mxu1 %v3850_v33  ;;  %v3901_v29 = vld [vmem:[%s4896_s9 + $0x5c0] ss:$16 sps:$4 sm:$0xff]   ;;  %v3909_v33 = vld [vmem:[%s4896_s9 + $0x5a4] ss:$16 sps:$4 sm:$0xff]  }
 0x18c   : > { %3017 = vmatprep.subr.bf16.mxu0 %v3855_v34  ;;  %3058 = vmatprep.subr.bf16.mxu1 %v3858_v8  ;;  %v3912_v34 = vld [vmem:[%s4896_s9 + $0x7a4] ss:$16 sps:$4 sm:$0xff]   ;;  %v3910_v8 = vld [vmem:[%s4896_s9 + $0x7a0] ss:$16 sps:$4 sm:$0xff]  }
 0x18f   : > { %3018 = vmatpush1.bf16.msra.mxu0 %v3853_v36  ;;  %3059 = vmatpush1.bf16.msra.mxu1 %v3856_v37  ;;  %v3915_v36 = vld [vmem:[%s4896_s9 + $0x584] ss:$16 sps:$4 sm:$0xff]  }
 0x190   : > { %3019 = vmatprep.subr.bf16.mxu0 %v3861_v38  ;;  %3060 = vmatprep.subr.bf16.mxu1 %v3864_v39  ;;  %v3918_v37 = vld [vmem:[%s4896_s9 + $0x784] ss:$16 sps:$4 sm:$0xff]   ;;  %v3913_v38 = vld [vmem:[%s4896_s9 + $0x580] ss:$16 sps:$4 sm:$0xff]  }
 0x191   : > { %v3916_v39 = vld [vmem:[%s4896_s9 + $0x780] ss:$16 sps:$4 sm:$0xff]  }
 0x193   : > { %3020 = vmatpush1.bf16.msra.mxu0 %v3859_v40  ;;  %3061 = vmatpush1.bf16.msra.mxu1 %v3862_v41  ;;  %v3921_v40 = vld [vmem:[%s4896_s9 + $0x564] ss:$16 sps:$4 sm:$0xff]  }
 0x194   : > { %3021 = vmatprep.subr.bf16.mxu0 %v3867_v42  ;;  %3062 = vmatprep.subr.bf16.mxu1 %v3870_v43  ;;  %v3924_v41 = vld [vmem:[%s4896_s9 + $0x764] ss:$16 sps:$4 sm:$0xff]   ;;  %v3919_v42 = vld [vmem:[%s4896_s9 + $0x560] ss:$16 sps:$4 sm:$0xff]  }
 0x195   : > { %v3922_v43 = vld [vmem:[%s4896_s9 + $0x760] ss:$16 sps:$4 sm:$0xff]  }
 0x197   : > { %3022 = vmatpush1.bf16.msra.mxu0 %v3865_v44  ;;  %3063 = vmatpush1.bf16.msra.mxu1 %v3868_v45  ;;  %v3927_v44 = vld [vmem:[%s4896_s9 + $0x544] ss:$16 sps:$4 sm:$0xff]  }
 0x198   : > { %3023 = vmatprep.subr.bf16.mxu0 %v3873_v46  ;;  %3064 = vmatprep.subr.bf16.mxu1 %v3876_v47  ;;  %v3930_v45 = vld [vmem:[%s4896_s9 + $0x744] ss:$16 sps:$4 sm:$0xff]   ;;  %v3925_v46 = vld [vmem:[%s4896_s9 + $0x540] ss:$16 sps:$4 sm:$0xff]   ;;  %v869_v47 = vsub.s32 6, %v5080_v6 }
 0x19b   : > { %3024 = vmatpush1.bf16.msra.mxu0 %v3871_v48  ;;  %3065 = vmatpush1.bf16.msra.mxu1 %v3874_v49  ;;  %v861_v48 = vsub.s32 4, %v5080_v6  ;;  %v3928_v49 = vld [vmem:[%s4896_s9 + $0x740] ss:$16 sps:$4 sm:$0xff]  }
 0x19c   : > { %3025 = vmatprep.subr.bf16.mxu0 %v3879_v50  ;;  %3066 = vmatprep.subr.bf16.mxu1 %v3882_v51  ;;  %v3933_v50 = vld [vmem:[%s4896_s9 + $0x524] ss:$16 sps:$4 sm:$0xff]  }
 0x19d   : > { %v3936_v51 = vld [vmem:[%s4896_s9 + $0x724] ss:$16 sps:$4 sm:$0xff]  }
 0x19f   : > { %3026 = vmatpush1.bf16.msra.mxu0 %v3877_v52  ;;  %3067 = vmatpush1.bf16.msra.mxu1 %v3880_v53  ;;  %v870_v52 = vrot.slane %v5087_v10, %v869_v47  ;;  %v3931_v53 = vld [vmem:[%s4896_s9 + $0x520] ss:$16 sps:$4 sm:$0xff]   ;;  %v3997_v47 = vld [vmem:[%s4896_s9 + $0x1c8] ss:$16 sps:$4 sm:$0xff]  }
 0x1a0   : > { %3027 = vmatprep.subr.bf16.mxu0 %v3885_v54  ;;  %3068 = vmatprep.subr.bf16.mxu1 %v3888_v55  ;;  %v862_v54 = vrot.slane %v5087_v10, %v861_v48  ;;  %v3934_v55 = vld [vmem:[%s4896_s9 + $0x720] ss:$16 sps:$4 sm:$0xff]   ;;  %v4000_v48 = vld [vmem:[%s4896_s9 + $0x3c8] ss:$16 sps:$4 sm:$0xff]  }
 0x1a1   : > { %v3940_v10 = vld [vmem:[%s4896_s9 + $0x700] ss:$16 sps:$4 sm:$0xff]  }
 0x1a2   : > { %v5146_v63 = vpop.f32.mrf.mxu0  ;;  %v5150_v2 = vpop.f32.mrf.mxu1 }
 0x1a3   : > { %3028 = vmatpush1.bf16.msra.mxu0 %v3883_v58  ;;  %3069 = vmatpush1.bf16.msra.mxu1 %v3886_v59  ;;  %v1361_v58 = vadd.f32 %v5150_v2, %v870_v52  ;;  %v3937_v59 = vld [vmem:[%s4896_s9 + $0x500] ss:$16 sps:$4 sm:$0xff]   ;;  %v4006_v52 = vld [vmem:[%s4896_s9 + $0x3a8] ss:$16 sps:$4 sm:$0xff]  }
 0x1a4   : > { %3029 = vmatprep.subr.bf16.mxu0 %v3891_v60  ;;  %v1321_v5 = vpop.f32.mrf.mxu0  ;;  %3070 = vmatprep.subr.bf16.mxu1 %v3894_v61  ;;  %v1362_v16 = vpop.f32.mrf.mxu1  ;;  %v1320_v60 = vadd.f32 %v5146_v63, %v862_v54  ;;  %v3945_v61 = vld [vmem:[%s4896_s9 + $0xec] ss:$16 sps:$4 sm:$0xff]   ;;  %v3946_v63 = vld [vmem:[%s4896_s9 + $0x2e8] ss:$16 sps:$4 sm:$0xff]  }
 0x1a5   : > { %v1322_v15 = vadd.f32 %v1321_v5, %v866_v62  ;;  %v1363_v18 = vadd.f32 %v1362_v16, %v874_v0  ;;  %v3948_v62 = vld [vmem:[%s4896_s9 + $0x2ec] ss:$16 sps:$4 sm:$0xff]   ;;  %v5199_v0 = vpack.c.bf16 %v1361_v58, %v1361_v58  ;;  %v3949_v5 = vld [vmem:[%s4896_s9 + $0xc8] ss:$16 sps:$4 sm:$0xff]  }
 0x1a6   : > { %v1323_v17 = vpop.f32.mrf.mxu0  ;;  %v1364_v20 = vpop.f32.mrf.mxu1  ;;  %v5202_v2 = vpack.c.bf16 %v1320_v60, %v1320_v60  ;;  %v3960_v16 = vld [vmem:[%s4896_s9 + $0x2ac] ss:$16 sps:$4 sm:$0xff]   ;;  %v4018_v60 = vld [vmem:[%s4896_s9 + $0x368] ss:$16 sps:$4 sm:$0xff]  }
 0x1a7   : > { %3030 = vmatpush1.bf16.msra.mxu0 %v3889_v1  ;;  %v5156_v19 = vpack.c.bf16 %v1322_v15, %v1322_v15  ;;  %3071 = vmatpush1.bf16.msra.mxu1 %v3892_v3  ;;  %v5160_v23 = vpack.c.bf16 %v1363_v18, %v1363_v18  ;;  %v3943_v1 = vld [vmem:[%s4896_s9 + $0xe8] ss:$16 sps:$4 sm:$0xff]   ;;  %v3951_v3 = vld [vmem:[%s4896_s9 + $0xcc] ss:$16 sps:$4 sm:$0xff]  }
 0x1a8   : > { %3031 = vmatprep.subr.bf16.mxu0 %v3897_v4  ;;  %v1324_v24 = vpop.f32.mrf.mxu0  ;;  %3072 = vmatprep.subr.bf16.mxu1 %v3900_v14  ;;  %v1365_v28 = vpop.f32.mrf.mxu1  ;;  %v3954_v4 = vld [vmem:[%s4896_s9 + $0x2cc] ss:$16 sps:$4 sm:$0xff]   ;;  %v3952_v14 = vld [vmem:[%s4896_s9 + $0x2c8] ss:$16 sps:$4 sm:$0xff]  }
 0x1a9   : > { %3047 = vmatprep.mubr.bf16.mxu0 %v5156_v19  ;;  %3088 = vmatprep.mubr.bf16.mxu1 %v5160_v23  ;;  %v3957_v15 = vld [vmem:[%s4896_s9 + $0xac] ss:$16 sps:$4 sm:$0xff]   ;;  %v3955_v17 = vld [vmem:[%s4896_s9 + $0xa8] ss:$16 sps:$4 sm:$0xff]  }
 0x1aa   : > { %v3958_v18 = vld [vmem:[%s4896_s9 + $0x2a8] ss:$16 sps:$4 sm:$0xff]   ;;  %v3975_v28 = vld [vmem:[%s4896_s9 + $0x4c] ss:$16 sps:$4 sm:$0xff]  }
 0x1ab   : > { %3032 = vmatpush2.bf16.msra.mxu0 %v3895_v12  ;;  %3073 = vmatpush2.bf16.msra.mxu1 %v3898_v21  ;;  %v3966_v12 = vld [vmem:[%s4896_s9 + $0x28c] ss:$16 sps:$4 sm:$0xff]   ;;  %v3964_v20 = vld [vmem:[%s4896_s9 + $0x288] ss:$16 sps:$4 sm:$0xff]  }
 0x1ac   : > { %3033 = vmatprep.subr.bf16.mxu0 %v3903_v22  ;;  %3074 = vmatprep.subr.bf16.mxu1 %v3906_v25  ;;  %v3969_v21 = vld [vmem:[%s4896_s9 + $0x6c] ss:$16 sps:$4 sm:$0xff]   ;;  %v3967_v24 = vld [vmem:[%s4896_s9 + $0x68] ss:$16 sps:$4 sm:$0xff]  }
 0x1ad   : > { %v3972_v22 = vld [vmem:[%s4896_s9 + $0x26c] ss:$16 sps:$4 sm:$0xff]   ;;  %v3970_v25 = vld [vmem:[%s4896_s9 + $0x268] ss:$16 sps:$4 sm:$0xff]  }
 0x1ae   : > { %v4014_v54 = vld [vmem:[%s4896_s9 + $0x38c] ss:$16 sps:$4 sm:$0xff]  }
 0x1af   : > { %3034 = vmatpush2.bf16.msra.mxu0 %v3901_v29  ;;  %3075 = vmatpush2.bf16.msra.mxu1 %v3904_v32  ;;  %v3978_v29 = vld [vmem:[%s4896_s9 + $0x24c] ss:$16 sps:$4 sm:$0xff]   ;;  %v3973_v32 = vld [vmem:[%s4896_s9 + $0x48] ss:$16 sps:$4 sm:$0xff]  }
 0x1b0   : > { %3035 = vmatprep.subr.bf16.mxu0 %v3909_v33  ;;  %3076 = vmatprep.subr.bf16.mxu1 %v3912_v34  ;;  %v3976_v33 = vld [vmem:[%s4896_s9 + $0x248] ss:$16 sps:$4 sm:$0xff]   ;;  %v3981_v34 = vld [vmem:[%s4896_s9 + $0x2c] ss:$16 sps:$4 sm:$0xff]  }
 0x1b1   : > { %v4020_v58 = vld [vmem:[%s4896_s9 + $0x36c] ss:$16 sps:$4 sm:$0xff]  }
 0x1b3   : > { %3036 = vmatpush2.bf16.msra.mxu0 %v3907_v35  ;;  %3077 = vmatpush2.bf16.msra.mxu1 %v3910_v8  ;;  %v3984_v35 = vld [vmem:[%s4896_s9 + $0x22c] ss:$16 sps:$4 sm:$0xff]   ;;  %v3979_v8 = vld [vmem:[%s4896_s9 + $0x28] ss:$16 sps:$4 sm:$0xff]  }
 0x1b4   : > { %3037 = vmatprep.subr.bf16.mxu0 %v3915_v36  ;;  %3078 = vmatprep.subr.bf16.mxu1 %v3918_v37  ;;  %v3982_v36 = vld [vmem:[%s4896_s9 + $0x228] ss:$16 sps:$4 sm:$0xff]   ;;  %v3987_v37 = vld [vmem:[%s4896_s9 + $0xc] ss:$16 sps:$4 sm:$0xff]  }
 0x1b7   : > { %3038 = vmatpush2.bf16.msra.mxu0 %v3913_v38  ;;  %3079 = vmatpush2.bf16.msra.mxu1 %v3916_v39  ;;  %v3990_v38 = vld [vmem:[%s4896_s9 + $0x20c] ss:$16 sps:$4 sm:$0xff]   ;;  %v3985_v39 = vld [vmem:[%s4896_s9 + $0x8] ss:$16 sps:$4 sm:$0xff]  }
 0x1b8   : > { %3039 = vmatprep.subr.bf16.mxu0 %v3921_v40  ;;  %3080 = vmatprep.subr.bf16.mxu1 %v3924_v41  ;;  %v3988_v40 = vld [vmem:[%s4896_s9 + $0x208] ss:$16 sps:$4 sm:$0xff]   ;;  %v3993_v41 = vld [vmem:[%s4896_s9 + $0x1ec] ss:$16 sps:$4 sm:$0xff]  }
 0x1bb   : > { %3040 = vmatpush2.bf16.msra.mxu0 %v3919_v42  ;;  %3081 = vmatpush2.bf16.msra.mxu1 %v3922_v43  ;;  %v3996_v42 = vld [vmem:[%s4896_s9 + $0x3ec] ss:$16 sps:$4 sm:$0xff]   ;;  %v3991_v43 = vld [vmem:[%s4896_s9 + $0x1e8] ss:$16 sps:$4 sm:$0xff]  }
 0x1bc   : > { %3041 = vmatprep.subr.bf16.mxu0 %v3927_v44  ;;  %3082 = vmatprep.subr.bf16.mxu1 %v3930_v45  ;;  %v3994_v44 = vld [vmem:[%s4896_s9 + $0x3e8] ss:$16 sps:$4 sm:$0xff]   ;;  %v3999_v45 = vld [vmem:[%s4896_s9 + $0x1cc] ss:$16 sps:$4 sm:$0xff]  }
 0x1bf   : > { %3042 = vmatpush2.bf16.msra.mxu0 %v3925_v46  ;;  %3083 = vmatpush2.bf16.msra.mxu1 %v3928_v49  ;;  %v4002_v46 = vld [vmem:[%s4896_s9 + $0x3cc] ss:$16 sps:$4 sm:$0xff]  }
 0x1c0   : > { %3043 = vmatprep.subr.bf16.mxu0 %v3933_v50  ;;  %3084 = vmatprep.subr.bf16.mxu1 %v3936_v51  ;;  %v4005_v49 = vld [vmem:[%s4896_s9 + $0x1ac] ss:$16 sps:$4 sm:$0xff]   ;;  %v4003_v51 = vld [vmem:[%s4896_s9 + $0x1a8] ss:$16 sps:$4 sm:$0xff]  }
 0x1c1   : > { %v4008_v50 = vld [vmem:[%s4896_s9 + $0x3ac] ss:$16 sps:$4 sm:$0xff]  }
 0x1c3   : > { %3044 = vmatpush2.bf16.msra.mxu0 %v3931_v53  ;;  %3085 = vmatpush2.bf16.msra.mxu1 %v3934_v55  ;;  %v4011_v53 = vld [vmem:[%s4896_s9 + $0x18c] ss:$16 sps:$4 sm:$0xff]   ;;  %v4009_v55 = vld [vmem:[%s4896_s9 + $0x188] ss:$16 sps:$4 sm:$0xff]  }
 0x1c4   : > { %3045 = vmatprep.subr.bf16.mxu0 %v3939_v56  ;;  %3086 = vmatprep.subr.bf16.mxu1 %v3942_v57  ;;  %v4012_v56 = vld [vmem:[%s4896_s9 + $0x388] ss:$16 sps:$4 sm:$0xff]   ;;  %v4017_v57 = vld [vmem:[%s4896_s9 + $0x16c] ss:$16 sps:$4 sm:$0xff]  }
 0x1c7   : > { %3046 = vmatpush2.bf16.msra.mxu0 %v3937_v59  ;;  %3087 = vmatpush2.bf16.msra.mxu1 %v3940_v10  ;;  %v4015_v59 = vld [vmem:[%s4896_s9 + $0x168] ss:$16 sps:$4 sm:$0xff]   ;;  %v4023_v10 = vld [vmem:[%s4896_s9 + $0x14c] ss:$16 sps:$4 sm:$0xff]  }
 0x1c8   : > { %3097 = vmatprep.subr.bf16.mxu0 %v3945_v61  ;;  %3138 = vmatprep.subr.bf16.mxu1 %v3948_v62  ;;  %v4026_v61 = vld [vmem:[%s4896_s9 + $0x34c] ss:$16 sps:$4 sm:$0xff]   ;;  %v4021_v62 = vld [vmem:[%s4896_s9 + $0x148] ss:$16 sps:$4 sm:$0xff]  }
 0x1ca   : > { %3048 = vmatmul.mubr.bf16.vlgmr.msra.gmra.mxu0 %v5202_v2  ;;  %3089 = vmatmul.mubr.bf16.vlgmr.msra.gmra.mxu1 %v5199_v0 }
 0x1cb   : > { %3098 = vmatpush1.bf16.msra.mxu0 %v3943_v1  ;;  %3129 = vmatprep.mubr.bf16.mxu0 %v5105_v27  ;;  %v3963_v27 = vld [vmem:[%s4896_s9 + $0x8c] ss:$16 sps:$4 sm:$0xff]   ;;  %v4024_v1 = vld [vmem:[%s4896_s9 + $0x348] ss:$16 sps:$4 sm:$0xff]  }
 0x1cc   : > { %3139 = vmatpush1.bf16.msra.mxu1 %v3946_v63  ;;  %3170 = vmatprep.mubr.bf16.mxu1 %v5110_v31  ;;  %v3961_v31 = vld [vmem:[%s4896_s9 + $0x88] ss:$16 sps:$4 sm:$0xff]   ;;  %v4029_v63 = vld [vmem:[%s4896_s9 + $0x12c] ss:$16 sps:$4 sm:$0xff]  }
 0x1cd   : > { %3099 = vmatprep.subr.bf16.mxu0 %v3951_v3  ;;  %3140 = vmatprep.subr.bf16.mxu1 %v3954_v4  ;;  %v4032_v3 = vld [vmem:[%s4896_s9 + $0x32c] ss:$16 sps:$4 sm:$0xff]   ;;  %v4027_v4 = vld [vmem:[%s4896_s9 + $0x128] ss:$16 sps:$4 sm:$0xff]  }
 0x1cf   : > { %3100 = vmatpush1.bf16.msra.mxu0 %v3949_v5  ;;  %v4030_v5 = vld [vmem:[%s4896_s9 + $0x328] ss:$16 sps:$4 sm:$0xff]  }
 0x1d0   : > { %3141 = vmatpush1.bf16.msra.mxu1 %v3952_v14  ;;  %3101 = vmatprep.subr.bf16.mxu0 %v3957_v15  ;;  %v4035_v14 = vld [vmem:[%s4896_s9 + $0x10c] ss:$16 sps:$4 sm:$0xff]  }
 0x1d1   : > { %3142 = vmatprep.subr.bf16.mxu1 %v3960_v16  ;;  %v4038_v15 = vld [vmem:[%s4896_s9 + $0x30c] ss:$16 sps:$4 sm:$0xff]   ;;  %v4033_v16 = vld [vmem:[%s4896_s9 + $0x108] ss:$16 sps:$4 sm:$0xff]  }
 0x1d3   : > { %3102 = vmatpush1.bf16.msra.mxu0 %v3955_v17  ;;  %v4036_v17 = vld [vmem:[%s4896_s9 + $0x308] ss:$16 sps:$4 sm:$0xff]  }
 0x1d4   : > { %3143 = vmatpush1.bf16.msra.mxu1 %v3958_v18  ;;  %3103 = vmatprep.subr.bf16.mxu0 %v3963_v27  ;;  %v4041_v18 = vld [vmem:[%s4896_s9 + $0x4ec] ss:$16 sps:$4 sm:$0xff]  }
 0x1d5   : > { %3144 = vmatprep.subr.bf16.mxu1 %v3966_v12  ;;  %v4044_v27 = vld [vmem:[%s4896_s9 + $0x6ec] ss:$16 sps:$4 sm:$0xff]   ;;  %v4039_v12 = vld [vmem:[%s4896_s9 + $0x4e8] ss:$16 sps:$4 sm:$0xff]  }
 0x1d7   : > { %3104 = vmatpush1.bf16.msra.mxu0 %v3961_v31  ;;  %v4042_v31 = vld [vmem:[%s4896_s9 + $0x6e8] ss:$16 sps:$4 sm:$0xff]  }
 0x1d8   : > { %3145 = vmatpush1.bf16.msra.mxu1 %v3964_v20  ;;  %3105 = vmatprep.subr.bf16.mxu0 %v3969_v21  ;;  %v4047_v20 = vld [vmem:[%s4896_s9 + $0x4cc] ss:$16 sps:$4 sm:$0xff]  }
 0x1d9   : > { %3146 = vmatprep.subr.bf16.mxu1 %v3972_v22  ;;  %v4050_v21 = vld [vmem:[%s4896_s9 + $0x6cc] ss:$16 sps:$4 sm:$0xff]   ;;  %v4045_v22 = vld [vmem:[%s4896_s9 + $0x4c8] ss:$16 sps:$4 sm:$0xff]  }
 0x1db   : > { %3106 = vmatpush1.bf16.msra.mxu0 %v3967_v24  ;;  %v4048_v24 = vld [vmem:[%s4896_s9 + $0x6c8] ss:$16 sps:$4 sm:$0xff]  }
 0x1dc   : > { %3147 = vmatpush1.bf16.msra.mxu1 %v3970_v25  ;;  %3107 = vmatprep.subr.bf16.mxu0 %v3975_v28  ;;  %v4053_v25 = vld [vmem:[%s4896_s9 + $0x4ac] ss:$16 sps:$4 sm:$0xff]   ;;  %v4054_v28 = vld [vmem:[%s4896_s9 + $0x6a8] ss:$16 sps:$4 sm:$0xff]  }
 0x1dd   : > { %3148 = vmatprep.subr.bf16.mxu1 %v3978_v29  ;;  %v4062_v29 = vld [vmem:[%s4896_s9 + $0x68c] ss:$16 sps:$4 sm:$0xff]  }
 0x1df   : > { %3108 = vmatpush1.bf16.msra.mxu0 %v3973_v32  ;;  %v4060_v32 = vld [vmem:[%s4896_s9 + $0x688] ss:$16 sps:$4 sm:$0xff]  }
 0x1e0   : > { %3149 = vmatpush1.bf16.msra.mxu1 %v3976_v33  ;;  %3109 = vmatprep.subr.bf16.mxu0 %v3981_v34  ;;  %v4065_v33 = vld [vmem:[%s4896_s9 + $0x46c] ss:$16 sps:$4 sm:$0xff]  }
 0x1e1   : > { %3150 = vmatprep.subr.bf16.mxu1 %v3984_v35  ;;  %v4068_v34 = vld [vmem:[%s4896_s9 + $0x66c] ss:$16 sps:$4 sm:$0xff]   ;;  %v4063_v35 = vld [vmem:[%s4896_s9 + $0x468] ss:$16 sps:$4 sm:$0xff]  }
 0x1e3   : > { %3110 = vmatpush1.bf16.msra.mxu0 %v3979_v8  ;;  %v4066_v8 = vld [vmem:[%s4896_s9 + $0x668] ss:$16 sps:$4 sm:$0xff]  }
 0x1e4   : > { %3151 = vmatpush1.bf16.msra.mxu1 %v3982_v36  ;;  %3111 = vmatprep.subr.bf16.mxu0 %v3987_v37  ;;  %v4071_v36 = vld [vmem:[%s4896_s9 + $0x44c] ss:$16 sps:$4 sm:$0xff]  }
 0x1e5   : > { %3152 = vmatprep.subr.bf16.mxu1 %v3990_v38  ;;  %v4074_v37 = vld [vmem:[%s4896_s9 + $0x64c] ss:$16 sps:$4 sm:$0xff]   ;;  %v4069_v38 = vld [vmem:[%s4896_s9 + $0x448] ss:$16 sps:$4 sm:$0xff]  }
 0x1e7   : > { %3112 = vmatpush1.bf16.msra.mxu0 %v3985_v39  ;;  %v4072_v39 = vld [vmem:[%s4896_s9 + $0x648] ss:$16 sps:$4 sm:$0xff]  }
 0x1e8   : > { %3153 = vmatpush1.bf16.msra.mxu1 %v3988_v40  ;;  %3113 = vmatprep.subr.bf16.mxu0 %v3993_v41  ;;  %v4077_v40 = vld [vmem:[%s4896_s9 + $0x42c] ss:$16 sps:$4 sm:$0xff]  }
 0x1e9   : > { %3154 = vmatprep.subr.bf16.mxu1 %v3996_v42  ;;  %v4080_v41 = vld [vmem:[%s4896_s9 + $0x62c] ss:$16 sps:$4 sm:$0xff]   ;;  %v4075_v42 = vld [vmem:[%s4896_s9 + $0x428] ss:$16 sps:$4 sm:$0xff]  }
 0x1eb   : > { %3114 = vmatpush2.bf16.msra.mxu0 %v3991_v43  ;;  %v4078_v43 = vld [vmem:[%s4896_s9 + $0x628] ss:$16 sps:$4 sm:$0xff]  }
 0x1ec   : > { %3155 = vmatpush2.bf16.msra.mxu1 %v3994_v44  ;;  %3115 = vmatprep.subr.bf16.mxu0 %v3999_v45  ;;  %v4083_v44 = vld [vmem:[%s4896_s9 + $0x40c] ss:$16 sps:$4 sm:$0xff]  }
 0x1ed   : > { %3156 = vmatprep.subr.bf16.mxu1 %v4002_v46  ;;  %v4086_v45 = vld [vmem:[%s4896_s9 + $0x60c] ss:$16 sps:$4 sm:$0xff]   ;;  %v4081_v46 = vld [vmem:[%s4896_s9 + $0x408] ss:$16 sps:$4 sm:$0xff]  }
 0x1ef   : > { %3116 = vmatpush2.bf16.msra.mxu0 %v3997_v47  ;;  %v4084_v47 = vld [vmem:[%s4896_s9 + $0x608] ss:$16 sps:$4 sm:$0xff]  }
 0x1f0   : > { %3157 = vmatpush2.bf16.msra.mxu1 %v4000_v48  ;;  %3117 = vmatprep.subr.bf16.mxu0 %v4005_v49  ;;  %v4089_v48 = vld [vmem:[%s4896_s9 + $0x5ec] ss:$16 sps:$4 sm:$0xff]  }
 0x1f1   : > { %3158 = vmatprep.subr.bf16.mxu1 %v4008_v50  ;;  %v4092_v49 = vld [vmem:[%s4896_s9 + $0x7ec] ss:$16 sps:$4 sm:$0xff]   ;;  %v4087_v50 = vld [vmem:[%s4896_s9 + $0x5e8] ss:$16 sps:$4 sm:$0xff]  }
 0x1f3   : > { %3118 = vmatpush2.bf16.msra.mxu0 %v4003_v51  ;;  %v4090_v51 = vld [vmem:[%s4896_s9 + $0x7e8] ss:$16 sps:$4 sm:$0xff]  }
 0x1f4   : > { %3159 = vmatpush2.bf16.msra.mxu1 %v4006_v52  ;;  %3119 = vmatprep.subr.bf16.mxu0 %v4011_v53  ;;  %v4095_v52 = vld [vmem:[%s4896_s9 + $0x5cc] ss:$16 sps:$4 sm:$0xff]  }
 0x1f5   : > { %3160 = vmatprep.subr.bf16.mxu1 %v4014_v54  ;;  %v4098_v53 = vld [vmem:[%s4896_s9 + $0x7cc] ss:$16 sps:$4 sm:$0xff]   ;;  %v4093_v54 = vld [vmem:[%s4896_s9 + $0x5c8] ss:$16 sps:$4 sm:$0xff]  }
 0x1f7   : > { %3120 = vmatpush2.bf16.msra.mxu0 %v4009_v55  ;;  %v4096_v55 = vld [vmem:[%s4896_s9 + $0x7c8] ss:$16 sps:$4 sm:$0xff]  }
 0x1f8   : > { %3161 = vmatpush2.bf16.msra.mxu1 %v4012_v56  ;;  %3121 = vmatprep.subr.bf16.mxu0 %v4017_v57  ;;  %v4101_v56 = vld [vmem:[%s4896_s9 + $0x5ac] ss:$16 sps:$4 sm:$0xff]  }
 0x1f9   : > { %3162 = vmatprep.subr.bf16.mxu1 %v4020_v58  ;;  %v4104_v57 = vld [vmem:[%s4896_s9 + $0x7ac] ss:$16 sps:$4 sm:$0xff]   ;;  %v4099_v58 = vld [vmem:[%s4896_s9 + $0x5a8] ss:$16 sps:$4 sm:$0xff]  }
 0x1fb   : > { %3122 = vmatpush2.bf16.msra.mxu0 %v4015_v59  ;;  %v4102_v59 = vld [vmem:[%s4896_s9 + $0x7a8] ss:$16 sps:$4 sm:$0xff]  }
 0x1fc   : > { %3163 = vmatpush2.bf16.msra.mxu1 %v4018_v60  ;;  %3123 = vmatprep.subr.bf16.mxu0 %v4023_v10  ;;  %v4107_v60 = vld [vmem:[%s4896_s9 + $0x58c] ss:$16 sps:$4 sm:$0xff]  }
 0x1fd   : > { %3164 = vmatprep.subr.bf16.mxu1 %v4026_v61  ;;  %v4110_v10 = vld [vmem:[%s4896_s9 + $0x78c] ss:$16 sps:$4 sm:$0xff]   ;;  %v4105_v61 = vld [vmem:[%s4896_s9 + $0x588] ss:$16 sps:$4 sm:$0xff]  }
 0x1ff   : > { %3124 = vmatpush2.bf16.msra.mxu0 %v4021_v62  ;;  %v4108_v62 = vld [vmem:[%s4896_s9 + $0x788] ss:$16 sps:$4 sm:$0xff]  }
 0x200   : > { %3165 = vmatpush2.bf16.msra.mxu1 %v4024_v1  ;;  %3125 = vmatprep.subr.bf16.mxu0 %v4029_v63  ;;  %v4113_v1 = vld [vmem:[%s4896_s9 + $0x56c] ss:$16 sps:$4 sm:$0xff]  }
 0x201   : > { %3166 = vmatprep.subr.bf16.mxu1 %v4032_v3  ;;  %v4116_v63 = vld [vmem:[%s4896_s9 + $0x76c] ss:$16 sps:$4 sm:$0xff]   ;;  %v4111_v3 = vld [vmem:[%s4896_s9 + $0x568] ss:$16 sps:$4 sm:$0xff]  }
 0x203   : > { %3126 = vmatpush2.bf16.msra.mxu0 %v4027_v4  ;;  %v4114_v4 = vld [vmem:[%s4896_s9 + $0x768] ss:$16 sps:$4 sm:$0xff]  }
 0x204   : > { %3167 = vmatpush2.bf16.msra.mxu1 %v4030_v5  ;;  %3127 = vmatprep.subr.bf16.mxu0 %v4035_v14  ;;  %v4119_v5 = vld [vmem:[%s4896_s9 + $0x54c] ss:$16 sps:$4 sm:$0xff]  }
 0x205   : > { %3168 = vmatprep.subr.bf16.mxu1 %v4038_v15  ;;  %v4122_v14 = vld [vmem:[%s4896_s9 + $0x74c] ss:$16 sps:$4 sm:$0xff]   ;;  %v4117_v15 = vld [vmem:[%s4896_s9 + $0x548] ss:$16 sps:$4 sm:$0xff]  }
 0x207   : > { %3128 = vmatpush2.bf16.msra.mxu0 %v4033_v16  ;;  %v4120_v16 = vld [vmem:[%s4896_s9 + $0x748] ss:$16 sps:$4 sm:$0xff]  }
 0x208   : > { %3169 = vmatpush2.bf16.msra.mxu1 %v4036_v17  ;;  %3179 = vmatprep.subr.bf16.mxu0 %v4041_v18  ;;  %v4125_v17 = vld [vmem:[%s4896_s9 + $0x52c] ss:$16 sps:$4 sm:$0xff]  }
 0x209   : > { %3220 = vmatprep.subr.bf16.mxu1 %v4044_v27  ;;  %v4128_v18 = vld [vmem:[%s4896_s9 + $0x72c] ss:$16 sps:$4 sm:$0xff]   ;;  %v4123_v27 = vld [vmem:[%s4896_s9 + $0x528] ss:$16 sps:$4 sm:$0xff]  }
 0x20a   : > { %3130 = vmatmul.mubr.bf16.vlgmr.msra.gmra.mxu0 %v5108_v30  ;;  %v4056_v30 = vld [vmem:[%s4896_s9 + $0x6ac] ss:$16 sps:$4 sm:$0xff]  }
 0x20b   : > { %3171 = vmatmul.mubr.bf16.vlgmr.msra.gmra.mxu1 %v5103_v26  ;;  %3180 = vmatpush1.bf16.msra.mxu0 %v4039_v12  ;;  %v4051_v26 = vld [vmem:[%s4896_s9 + $0x4a8] ss:$16 sps:$4 sm:$0xff]  }
 0x20c   : > { %3211 = vmatprep.mubr.bf16.mxu0 %v5156_v19  ;;  %3221 = vmatpush1.bf16.msra.mxu1 %v4042_v31  ;;  %v4059_v19 = vld [vmem:[%s4896_s9 + $0x48c] ss:$16 sps:$4 sm:$0xff]   ;;  %v4126_v12 = vld [vmem:[%s4896_s9 + $0x728] ss:$16 sps:$4 sm:$0xff]  }
 0x20d   : > { %3252 = vmatprep.mubr.bf16.mxu1 %v5160_v23  ;;  %3181 = vmatprep.subr.bf16.mxu0 %v4047_v20  ;;  %v4057_v23 = vld [vmem:[%s4896_s9 + $0x488] ss:$16 sps:$4 sm:$0xff]   ;;  %v4131_v31 = vld [vmem:[%s4896_s9 + $0x50c] ss:$16 sps:$4 sm:$0xff]  }
 0x20e   : > { %3222 = vmatprep.subr.bf16.mxu1 %v4050_v21  ;;  %v4134_v20 = vld [vmem:[%s4896_s9 + $0x70c] ss:$16 sps:$4 sm:$0xff]   ;;  %v4129_v21 = vld [vmem:[%s4896_s9 + $0x508] ss:$16 sps:$4 sm:$0xff]  }
 0x20f   : > { %3182 = vmatpush1.bf16.msra.mxu0 %v4045_v22  ;;  %v4132_v22 = vld [vmem:[%s4896_s9 + $0x708] ss:$16 sps:$4 sm:$0xff]   ;;  %s3381_s9 = sshll.u32 %s4872_s8, 3 }
 0x210   : > { %3223 = vmatpush1.bf16.msra.mxu1 %v4048_v24  ;;  %3183 = vmatprep.subr.bf16.mxu0 %v4053_v25  ;;  %v1631_v24 = vld [vmem:[%s771_s17] sm:$0xf]  ;;  %s766_s25 = scalar_lea.vmem [#allocation3], %s3381_s9 }
 0x211   : > { %3224 = vmatprep.subr.bf16.mxu1 %v4056_v30  ;;  %v1636_v25 = vrot.slane %v1631_v24, %v845_v7  ;;  %v1640_v30 = vrot.slane %v1631_v24, %v849_v11  ;;  %s3299_s26 = sshll.u32 %s766_s25, 4  ;;  %s3300_s26 = int_to_ptr.vmem [resolvable:$true] %s3299_s26 }
 0x212   : > { %s4135_s11 = scalar_lea.vmem %s3300_s26, 128  ;;  %p4142_p3 = scmp.lt.s32.totalorder %s3300_s26, %s4140_s14 }
 0x213   : > { %3184 = vmatpush1.bf16.msra.mxu0 %v4051_v26  ;;  %p4136_p0 = scmp.ne.s32.totalorder %s3300_s26, %s4135_s11  ;;  %p4143_p4 = scmp.lt.s32.totalorder %s4141_s22, %s4135_s11 }
 0x214   : > { %3225 = vmatpush1.bf16.msra.mxu1 %v4054_v28  ;;  %3185 = vmatprep.subr.bf16.mxu0 %v4059_v19 }
 0x215   : > { %3226 = vmatprep.subr.bf16.mxu1 %v4062_v29  ;;  %p4137_p1 = pnand %p4136_p0, %p4269_p6  ;;  %p4144_p5 = por %p4143_p4, %p4142_p3 }
 0x217   : > { %3186 = vmatpush1.bf16.msra.mxu0 %v4057_v23  ;;  %p4138_p2 = pneg %p4137_p1 }
 0x218   : > { %3227 = vmatpush1.bf16.msra.mxu1 %v4060_v32  ;;  %3187 = vmatprep.subr.bf16.mxu0 %v4065_v33 }
 0x219   : > { %3228 = vmatprep.subr.bf16.mxu1 %v4068_v34  ;;  %p4145_p7 = pnand %p4144_p5, %p4138_p2 }
 0x21b   : > { %3188 = vmatpush1.bf16.msra.mxu0 %v4063_v35 }
 0x21c   : > { %3229 = vmatpush1.bf16.msra.mxu1 %v4066_v8  ;;  %3189 = vmatprep.subr.bf16.mxu0 %v4071_v36 }
 0x21d   : > { %3230 = vmatprep.subr.bf16.mxu1 %v4074_v37 }
 0x21f   : > { %3190 = vmatpush1.bf16.msra.mxu0 %v4069_v38 }
 0x220   : > { %3231 = vmatpush1.bf16.msra.mxu1 %v4072_v39  ;;  %3191 = vmatprep.subr.bf16.mxu0 %v4077_v40 }
 0x221   : > { %3232 = vmatprep.subr.bf16.mxu1 %v4080_v41 }
 0x223   : > { %3192 = vmatpush1.bf16.msra.mxu0 %v4075_v42 }
 0x224   : > { %3233 = vmatpush1.bf16.msra.mxu1 %v4078_v43  ;;  %3193 = vmatprep.subr.bf16.mxu0 %v4083_v44 }
 0x225   : > { %3234 = vmatprep.subr.bf16.mxu1 %v4086_v45 }
 0x227   : > { %3194 = vmatpush1.bf16.msra.mxu0 %v4081_v46 }
 0x228   : > { %3235 = vmatpush1.bf16.msra.mxu1 %v4084_v47  ;;  %3195 = vmatprep.subr.bf16.mxu0 %v4089_v48 }
 0x229   : > { %3236 = vmatprep.subr.bf16.mxu1 %v4092_v49 }
 0x22b   : > { %3196 = vmatpush2.bf16.msra.mxu0 %v4087_v50 }
 0x22c   : > { %3237 = vmatpush2.bf16.msra.mxu1 %v4090_v51  ;;  %3197 = vmatprep.subr.bf16.mxu0 %v4095_v52 }
 0x22d   : > { %3238 = vmatprep.subr.bf16.mxu1 %v4098_v53 }
 0x22f   : > { %3198 = vmatpush2.bf16.msra.mxu0 %v4093_v54 }
 0x230   : > { %3239 = vmatpush2.bf16.msra.mxu1 %v4096_v55  ;;  %3199 = vmatprep.subr.bf16.mxu0 %v4101_v56  ;;  %v1644_v55 = vrot.slane %v1631_v24, %v853_v9  ;;  %v1648_v56 = vrot.slane %v1631_v24, %v857_v13 }
 0x231   : > { %3240 = vmatprep.subr.bf16.mxu1 %v4104_v57 }
 0x233   : > { %3200 = vmatpush2.bf16.msra.mxu0 %v4099_v58  ;;  %v4198_v58 = vmov 1983009808  }
 0x234   : > { %3241 = vmatpush2.bf16.msra.mxu1 %v4102_v59  ;;  %3201 = vmatprep.subr.bf16.mxu0 %v4107_v60  ;;  %v3268_v59 = vunpack.c.l.s4 %v4198_v58 }
 0x235   : > { %3242 = vmatprep.subr.bf16.mxu1 %v4110_v10 }
 0x237   : > { %3202 = vmatpush2.bf16.msra.mxu0 %v4105_v61 }
 0x238   : > { %3243 = vmatpush2.bf16.msra.mxu1 %v4108_v62  ;;  %3203 = vmatprep.subr.bf16.mxu0 %v4113_v1  ;;  %v3269_v62 = vunpack.c.0.s8 %v3268_v59 }
 0x239   : > { %3244 = vmatprep.subr.bf16.mxu1 %v4116_v63 }
 0x23a   : > { %v3272_v9 = vsub.s32 %v3269_v62, %v5080_v6 }
 0x23b   : > { %3204 = vmatpush2.bf16.msra.mxu0 %v4111_v3 }
 0x23c   : > { %3245 = vmatpush2.bf16.msra.mxu1 %v4114_v4  ;;  %3205 = vmatprep.subr.bf16.mxu0 %v4119_v5 }
 0x23d   : > { %3246 = vmatprep.subr.bf16.mxu1 %v4122_v14 }
 0x23f   : > { %3206 = vmatpush2.bf16.msra.mxu0 %v4117_v15 }
 0x240   : > { %3247 = vmatpush2.bf16.msra.mxu1 %v4120_v16  ;;  %3207 = vmatprep.subr.bf16.mxu0 %v4125_v17 }
 0x241   : > { %3248 = vmatprep.subr.bf16.mxu1 %v4128_v18 }
 0x243   : > { %3208 = vmatpush2.bf16.msra.mxu0 %v4123_v27 }
 0x244   : > { %3249 = vmatpush2.bf16.msra.mxu1 %v4126_v12  ;;  %3209 = vmatprep.subr.bf16.mxu0 %v4131_v31 }
 0x245   : > { %3250 = vmatprep.subr.bf16.mxu1 %v4134_v20 }
 0x247   : > { %3210 = vmatpush2.bf16.msra.mxu0 %v4129_v21 }
 0x248   : > { %3251 = vmatpush2.bf16.msra.mxu1 %v4132_v22 }
 0x24a   : > { %3212 = vmatmul.mubr.bf16.vlgmr.msra.gmra.mxu0 %v5202_v2  ;;  %v2967_v26 = vpop.f32.mrf.mxu0  ;;  %v3008_v19 = vpop.f32.mrf.mxu1 }
 0x24b   : > { %3253 = vmatmul.mubr.bf16.vlgmr.msra.gmra.mxu1 %v5199_v0  ;;  %v2968_v28 = vadd.f32 %v2967_v26, %v1636_v25 }
 0x24c   : > { %v2969_v29 = vpop.f32.mrf.mxu0  ;;  %v3010_v33 = vpop.f32.mrf.mxu1 }
 0x24d   : > { %v3009_v23 = vadd.f32 %v3008_v19, %v2968_v28  ;;  %v2970_v32 = vadd.f32 %v2969_v29, %v1640_v30 }
 0x24e   : > { %v2971_v34 = vpop.f32.mrf.mxu0  ;;  %v3012_v8 = vpop.f32.mrf.mxu1 }
 0x24f   : > { %v3011_v35 = vadd.f32 %v3010_v33, %v2970_v32 }
 0x250   : > { %v2972_v36 = vpop.f32.mrf.mxu0  ;;  %v3013_v7 = vpop.f32.mrf.mxu1 }
 0x28a   : > { %v3049_v37 = vpop.f32.mrf.mxu0  ;;  %v3090_v39 = vpop.f32.mrf.mxu1 }
 0x28b   : > { %v3050_v38 = vadd.f32 %v3049_v37, %v3009_v23 }
 0x28c   : > { %v3051_v11 = vpop.f32.mrf.mxu0  ;;  %v3092_v41 = vpop.f32.mrf.mxu1 }
 0x28d   : > { %v3091_v40 = vadd.f32 %v3090_v39, %v3050_v38  ;;  %v3052_v2 = vadd.f32 %v3051_v11, %v3011_v35 }
 0x28e   : > { %v3053_v42 = vpop.f32.mrf.mxu0  ;;  %v3094_v43 = vpop.f32.mrf.mxu1 }
 0x28f   : > { %v3093_v0 = vadd.f32 %v3092_v41, %v3052_v2 }
 0x290   : > { %v3054_v44 = vpop.f32.mrf.mxu0  ;;  %v3095_v46 = vpop.f32.mrf.mxu1 }
 0x291   : > { %v3265_v45 = vcombine.low %v3091_v40, %v3093_v0 }
 0x293   : > { %v3273_v31 = vrot.slane %v3265_v45, %v3272_v9 }
 0x2ca   : > { %v3131_v47 = vpop.f32.mrf.mxu0 }
 0x2cb   : > { %v3172_v48 = vpop.f32.mrf.mxu1  ;;  %v3132_v57 = vadd.f32 %v3131_v47, %v1644_v55 }
 0x2cc   : > { %v3133_v49 = vpop.f32.mrf.mxu0 }
 0x2cd   : > { %v3174_v50 = vpop.f32.mrf.mxu1  ;;  %v3134_v60 = vadd.f32 %v3133_v49, %v1648_v56  ;;  %v3173_v10 = vadd.f32 %v3172_v48, %v3132_v57 }
 0x2ce   : > { %v3135_v51 = vpop.f32.mrf.mxu0 }
 0x2cf   : > { %v3176_v52 = vpop.f32.mrf.mxu1  ;;  %v3175_v1 = vadd.f32 %v3174_v50, %v3134_v60 }
 0x2d0   : > { %v3136_v53 = vpop.f32.mrf.mxu0 }
 0x2d1   : > { %v3177_v54 = vpop.f32.mrf.mxu1 }
 0x30a   : > { %v3213_v61 = vpop.f32.mrf.mxu0 }
 0x30b   : > { %v3214_v63 = vadd.f32 %v3213_v61, %v3173_v10  ;;  %v3254_v3 = vpop.f32.mrf.mxu1 }
 0x30c   : > { %v3215_v4 = vpop.f32.mrf.mxu0 }
 0x30d   : > { %v3216_v5 = vadd.f32 %v3215_v4, %v3175_v1  ;;  %v3256_v14 = vpop.f32.mrf.mxu1  ;;  %v3255_v13 = vadd.f32 %v3254_v3, %v3214_v63 }
 0x30e   : > { %v3217_v15 = vpop.f32.mrf.mxu0 }
 0x30f   : > { %v3257_v16 = vadd.f32 %v3256_v14, %v3216_v5  ;;  %v3258_v17 = vpop.f32.mrf.mxu1 }
 0x310   : > { %v3218_v18 = vpop.f32.mrf.mxu0 }
 0x311   : > { %v3266_v27 = vcombine.low %v3255_v13, %v3257_v16  ;;  %v3259_v12 = vpop.f32.mrf.mxu1 }
 0x313   : > { %v3280_v20 = vrot.slane %v3266_v27, %v3272_v9 }
 0x315   : > { %v3281_v21 = vcombine.low %v3273_v31, %v3280_v20 }
 0x317   : > { %3283 = vst [vmem:[%s766_s25] sm:$0xff] %v3281_v21 }
 0x318   : > { %4148 = shalt.err (!%p4145_p7)
}
 0x319   : > { %s4149_s15 = scalar_lea.hbm %s3297_s7, 128  ;;  %s4153_s13 = scalar_lea.hbm %s5393_s5, 256 }
 0x31a   : > { %p4150_p10 = scmp.ne.s32.totalorder %s3297_s7, %s4149_s15  ;;  %p4154_p13 = scmp.lt.s32.totalorder %s3297_s7, %s5393_s5 }
 0x31b   : > { %p4155_p0 = scmp.lt.s32.totalorder %s4153_s13, %s4149_s15 }
 0x31c   : > { %p4151_p11 = pnand %p4150_p10, %p4269_p6 }
 0x31d   : > { %p4156_p1 = por %p4155_p0, %p4154_p13 }
 0x31e   : > { %p4152_p12 = pneg %p4151_p11 }
 0x320   : > { %p4157_p9 = pnand %p4156_p1, %p4152_p12 }
 0x322   : > { %4160 = shalt.err (!%p4157_p9)
}
 0x323   : > { %3710 = dma.vmem_to_hbm [thread:$0]  (%p4269_p6), %s3300_s26, 128, %s3297_s7, %s3285_s10  }
 0x324 PF: > { %s3311_s23 = sand.u32 1, %s4183_s18   ;;  %p5397_p2 = scmp.ge.s32.totalorder %s4195_s21, 2 }
 0x325   : > { %s3312_s25 = scalar_lea.sflag [#allocation4], %s3311_s23 }
 0x326   : > { %p3713_p3 = pnand %p5397_p2, %p4273_p8 }
 0x328   : > { %p3714_p4 = pneg %p3713_p3 }
 0x32a   : > { %4178 = dma.done.wait (%p3714_p4), %s3312_s25, 128  }
 0x32b   : > { %4180 = vsyncadd (%p3714_p4), %s3312_s25, 4294967168  ;;  %p15_p9 = scmp.ge.s32.totalorder %s4255_s24, 4   ;;  %s5398_s18 = smov %s4187_s19 }
 0x32c   : > { %s5399_s19 = smov %s4191_s20  ;;  %s5400_s20 = smov %s4267_s27 }
 0x32d   : > { %s5401_s21 = smov %s4255_s24  ;;  %17 = sbr.rel (!%p15_p9) target bundleno = 3 (0x3), region = 106 }
 0x332   :  { %3317 = vsyncpa [#allocation4], 1 }
 0x333   :  { %3319 = vsyncpa [#allocation4 + $0x1], 1 }

</bundles_post_ra>
